<compile_context>
chip_gen: v6e
topology: v6e:2x2x1
jax: 0.10.0
libtpu: 0.0.40
codegen_flags: <defaults>
</compile_context>

<pallas_src>
import jax
import jax.numpy as jnp
from jax import lax
from jax.experimental import pallas as pl
from jax.experimental.pallas import tpu as pltpu


# ----------------------------------------------------------------------------
# Host-side layout folding (tiny tensors; pure rearrangement + zero insertion,
# so casting the folded tensors to bf16 == folding bf16-cast originals).
# ----------------------------------------------------------------------------
def _fold_input(state):
    """NCHW -> channels-last space-to-depth(8): (B, Hb, Wb, 64*C)."""
    B, C, H, W = state.shape
    x = jnp.transpose(state, (0, 2, 3, 1))                     # (B, H, W, C)
    Hp, Wp = -(-H // 8) * 8, -(-W // 8) * 8
    x = jnp.pad(x, ((0, 0), (0, Hp - H), (0, Wp - W), (0, 0)))
    x = x.reshape(B, Hp // 8, 8, Wp // 8, 8, C)
    x = x.transpose(0, 1, 3, 2, 4, 5)                          # (B, Hb, Wb, 8, 8, C)
    return x.reshape(B, Hp // 8, Wp // 8, 64 * C)


def _fold_conv1(w1, b1):
    """Conv2d(4,32,k=8,s=4) -> 2x2 stride-1 conv over the depth-8-folded input,
    producing a 2x2-output-parity-packed 128-channel activation.
    Returns tap-major flattened weight (1024, 128) and bias (1, 128)."""
    C_out, C_in, _, _ = w1.shape                               # (32, 4, 8, 8)
    wt = jnp.transpose(w1, (2, 3, 1, 0))                       # (8, 8, Cin, Cout)
    blocks = []
    for dp in (0, 1):
        for dq in (0, 1):
            pad = jnp.zeros((16, 16, C_in, C_out), w1.dtype)
            pad = pad.at[4 * dp:4 * dp + 8, 4 * dq:4 * dq + 8].set(wt)
            blocks.append(pad)
    wf = jnp.stack(blocks, 0).reshape(2, 2, 16, 16, C_in, C_out)  # [dp,dq,r,s,c,co]
    wf = wf.reshape(2, 2, 2, 8, 2, 8, C_in, C_out)                # [dp,dq,km,di,kn,dj,c,co]
    wf = wf.transpose(2, 4, 3, 5, 6, 0, 1, 7)                     # [km,kn,di,dj,c,dp,dq,co]
    wf = wf.reshape(4 * 64 * C_in, 4 * C_out)                     # (1024, 128), tap-major K
    bf = jnp.tile(b1, 4).reshape(1, 4 * C_out)                    # (1, 128)
    return wf, bf


def _fold_conv2(w2, b2):
    """Conv2d(32,64,k=4,s=2) -> 2x2 stride-1 conv over the parity-packed act1.
    Tap-major (512, 128) weight with output channels 64..127 zero-padded (keeps
    every later lane slice 128-aligned), bias (1, 128) likewise padded."""
    C_out, C_in, _, _ = w2.shape                               # (64, 32, 4, 4)
    wt = jnp.transpose(w2, (2, 3, 1, 0))                       # (4, 4, Cin, Cout)
    wt = wt.reshape(2, 2, 2, 2, C_in, C_out)                   # [ki,dp,kj,dq,c1,c2]
    wt = wt.transpose(0, 2, 1, 3, 4, 5)                        # [ki,kj,dp,dq,c1,c2]
    wt = wt.reshape(4 * 4 * C_in, C_out)                       # (512, 64), tap-major K
    wt = jnp.concatenate([wt, jnp.zeros_like(wt)], axis=1)     # (512, 128)
    bf = jnp.concatenate([b2, jnp.zeros_like(b2)]).reshape(1, 2 * C_out)
    return wt, bf


def _fold_conv3(w3, b3):
    """Conv2d(64,64,k=3,s=1): tap-major (1152, 64) weight; the rows matching the
    64 zero-padded act2 channels are zero."""
    C_out, C_in, K, _ = w3.shape                               # (64, 64, 3, 3)
    wt = jnp.transpose(w3, (2, 3, 1, 0)).reshape(K * K, C_in, C_out)   # (9, 64, 64)
    wt = jnp.concatenate([wt, jnp.zeros_like(wt)], axis=1)             # (9, 128, 64)
    return wt.reshape(K * K * 2 * C_in, C_out), b3.reshape(1, C_out)


# ----------------------------------------------------------------------------
# The fused Pallas kernel (one grid step = one block of bb images)
# ----------------------------------------------------------------------------
def _build_kernel(Wb, M1, M2, M3):
    # Flat row-major spatial layout with pitch Wb: a conv tap == a row shift.
    shifts1 = tuple(km * Wb + kn for km in (0, 1) for kn in (0, 1))   # conv1 taps
    shifts2 = shifts1                                                 # conv2 taps
    shifts3 = tuple(i * Wb + j for i in (0, 1, 2) for j in (0, 1, 2))  # conv3 taps

    def kernel(xf_ref, w1_ref, b1_ref, w2_ref, b2_ref, w3_ref, b3_ref,
               o_ref, a1_ref, a2_ref):
        # ---- conv1 + ReLU: single (M1,1024)@(1024,128) MXU matmul ----------
        lhs1 = jnp.concatenate([xf_ref[0, s:s + M1, :] for s in shifts1], axis=1)
        y1 = jnp.dot(lhs1, w1_ref[...], preferred_element_type=jnp.float32)
        a1_ref[...] = jnp.maximum(y1 + b1_ref[...], 0.0).astype(jnp.bfloat16)

        # ---- conv2 + ReLU: single (M2,512)@(512,128) matmul (N zero-padded) -
        lhs2 = jnp.concatenate([a1_ref[s:s + M2, :] for s in shifts2], axis=1)
        y2 = jnp.dot(lhs2, w2_ref[...], preferred_element_type=jnp.float32)
        a2_ref[...] = jnp.maximum(y2 + b2_ref[...], 0.0).astype(jnp.bfloat16)

        # ---- conv3 + ReLU: single (M3,1152)@(1152,64) matmul, one store -----
        lhs3 = jnp.concatenate([a2_ref[s:s + M3, :] for s in shifts3], axis=1)
        y3 = jnp.dot(lhs3, w3_ref[...], preferred_element_type=jnp.float32)
        o_ref[0, 0:M3, :] = jnp.maximum(y3 + b3_ref[...], 0.0)

    return kernel


# ----------------------------------------------------------------------------
# Forward pass (equivalent of BaseNetwork.forward)
# ----------------------------------------------------------------------------
def base_network_forward(params, state, block_batch=8):
    """state: (B, 4, H, W) NCHW float32 -> (B, 64*H3*W3) like nn.Flatten."""
    w1, b1 = params["conv1"]
    w2, b2 = params["conv2"]
    w3, b3 = params["conv3"]
    B, C, H, W = state.shape
    assert C == 4
    H1, W1 = (H - 8) // 4 + 1, (W - 8) // 4 + 1
    H2, W2 = (H1 - 4) // 2 + 1, (W1 - 4) // 2 + 1
    H3, W3 = H2 - 2, W2 - 2
    assert H3 >= 1 and W3 >= 1
    # Stride folding packs conv1's 2x2 output parity into channels; it needs an
    # even conv1 output (true for 84x84 Atari frames and the 44x44 test shape).
    # TODO(synk): support odd conv1 output sizes (needs a parity-padding path).
    assert H1 % 2 == 0 and W1 % 2 == 0

    xf = _fold_input(state)                          # (B, Hb, Wb, 256) f32
    Hb, Wb = xf.shape[1], xf.shape[2]

    bb = max(1, min(block_batch, B))                 # images per grid step
    B_pad = -(-B // bb) * bb
    nblocks = B_pad // bb
    if B_pad != B:
        xf = jnp.pad(xf, ((0, B_pad - B), (0, 0), (0, 0), (0, 0)))

    R0 = bb * Hb * Wb                                # flat rows per grid step
    M1 = R0 - (Wb + 1)                               # conv1 rows (incl. edge junk)
    M2 = M1 - (Wb + 1)                               # conv2 rows
    M3 = M2 - 2 * (Wb + 1)                           # conv3 rows (== last valid + 1)

    xf = xf.reshape(nblocks, R0, 256).astype(jnp.bfloat16)
    w1k, b1k = _fold_conv1(w1, b1)                   # (1024,128), (1,128)
    w2k, b2k = _fold_conv2(w2, b2)                   # (512,128),  (1,128)
    w3k, b3k = _fold_conv3(w3, b3)                   # (1152,64),  (1,64)
    w1k, w2k, w3k = (w.astype(jnp.bfloat16) for w in (w1k, w2k, w3k))

    kernel = _build_kernel(Wb, M1, M2, M3)

    flops = 2 * nblocks * (M1 * 1024 * 128 + M2 * 512 * 128 + M3 * 1152 * 64)
    bytes_accessed = (xf.size * 2
                      + (w1k.size + w2k.size + w3k.size) * 2
                      + (b1k.size + b2k.size + b3k.size) * 4
                      + nblocks * R0 * 64 * 4)

    out = pl.pallas_call(
        kernel,
        out_shape=jax.ShapeDtypeStruct((nblocks, R0, 64), jnp.float32),
        grid=(nblocks,),
        in_specs=[
            pl.BlockSpec((1, R0, 256), lambda b: (b, 0, 0)),   # folded input
            # Weight/bias index_maps are constant, so they are DMA'd once and
            # stay VMEM-resident across grid steps.
            pl.BlockSpec((1024, 128), lambda b: (0, 0)),       # conv1 weight
            pl.BlockSpec((1, 128), lambda b: (0, 0)),          # conv1 bias
            pl.BlockSpec((512, 128), lambda b: (0, 0)),        # conv2 weight (N padded)
            pl.BlockSpec((1, 128), lambda b: (0, 0)),          # conv2 bias  (padded)
            pl.BlockSpec((1152, 64), lambda b: (0, 0)),        # conv3 weight (K padded)
            pl.BlockSpec((1, 64), lambda b: (0, 0)),           # conv3 bias
        ],
        out_specs=pl.BlockSpec((1, R0, 64), lambda b: (b, 0, 0)),
        scratch_shapes=[
            pltpu.VMEM((M1, 128), jnp.bfloat16),               # act1 staging
            pltpu.VMEM((M2, 128), jnp.bfloat16),               # act2 staging (64 real + 64 zero)
        ],
        compiler_params=pltpu.CompilerParams(
            dimension_semantics=("parallel",)),
        cost_estimate=pl.CostEstimate(flops=flops, transcendentals=0,
                                      bytes_accessed=bytes_accessed),
    )(xf, w1k, b1k, w2k, b2k, w3k, b3k)

    # Drop the edge-junk rows, then flatten like nn.Flatten on NCHW output.
    out = out.reshape(B_pad, Hb, Wb, 64)[:B, :H3, :W3, :]
    return out.transpose(0, 3, 1, 2).reshape(B, -1)


# ----------------------------------------------------------------------------
# Parameter init (PyTorch-style) and pure-XLA reference
# ----------------------------------------------------------------------------
def init_params(key):
    def conv_init(k, c_out, c_in, ksz):
        kw_key, kb_key = jax.random.split(k)
        fan_in = c_in * ksz * ksz
        bound = 1.0 / float(jnp.sqrt(fan_in))
        w = jax.random.uniform(kw_key, (c_out, c_in, ksz, ksz), jnp.float32,
                               -bound, bound)
        b = jax.random.uniform(kb_key, (c_out,), jnp.float32, -bound, bound)
        return w, b

    k1, k2, k3 = jax.random.split(key, 3)
    return {
        "conv1": conv_init(k1, 32, 4, 8),    # Conv2d(4, 32, k=8, s=4)
        "conv2": conv_init(k2, 64, 32, 4),   # Conv2d(32, 64, k=4, s=2)
        "conv3": conv_init(k3, 64, 64, 3),   # Conv2d(64, 64, k=3, s=1)
    }


def reference_forward(params, state, operand_dtype=jnp.float32):
    """Pure-XLA reference.  With operand_dtype=bf16 it matches the kernel's MXU
    operand precision (f32 accumulation either way), so only accumulation-order
    differences remain and a tight tolerance is valid."""
    x = state
    for name, stride in (("conv1", 4), ("conv2", 2), ("conv3", 1)):
        w, b = params[name]
        y = lax.conv_general_dilated(
            x.astype(operand_dtype), w.astype(operand_dtype),
            window_strides=(stride, stride), padding="VALID",
            dimension_numbers=("NCHW", "OIHW", "NCHW"),
            preferred_element_type=jnp.float32,
            precision=lax.Precision.HIGHEST)
        x = jnp.maximum(y + b[None, :, None, None].astype(jnp.float32), 0.0)
    return x.reshape(x.shape[0], -1)


if __name__ == "__main__":
    key = jax.random.PRNGKey(0)
    pkey, xkey = jax.random.split(key)
    params = init_params(pkey)

    # 4 stacked frames, 44x44 spatial -> conv stack gives 10x10 -> 4x4 -> 2x2,
    # flatten = 64*2*2 = 256 features per example.
    B, C, H, W = 2, 4, 44, 44
    state = jax.random.uniform(xkey, (B, C, H, W), jnp.float32)

    fwd = jax.jit(base_network_forward)
    out = jax.block_until_ready(fwd(params, state))

    # Matched-precision reference (bf16 MXU operands, f32 accumulation).
    ref = jax.block_until_ready(reference_forward(params, state, jnp.bfloat16))

    assert out.shape == (B, 64 * 2 * 2), out.shape
    max_err = float(jnp.max(jnp.abs(out - ref)))
    assert jnp.allclose(out, ref, rtol=1e-3, atol=1e-3), max_err
    print("KERNEL_OK")
</pallas_src>

<mosaic_0001>
module attributes {stable_mosaic.version = 11 : i64} {
  func.func @kernel(%arg0: i32, %arg1: memref<1x72x256xbf16, #tpu.memory_space<vmem>>, %arg2: memref<1024x128xbf16, #tpu.memory_space<vmem>>, %arg3: memref<1x128xf32, #tpu.memory_space<vmem>>, %arg4: memref<512x128xbf16, #tpu.memory_space<vmem>>, %arg5: memref<1x128xf32, #tpu.memory_space<vmem>>, %arg6: memref<1152x64xbf16, #tpu.memory_space<vmem>>, %arg7: memref<1x64xf32, #tpu.memory_space<vmem>>, %arg8: memref<1x72x64xf32, #tpu.memory_space<vmem>>, %arg9: memref<65x128xbf16, #tpu.memory_space<vmem>>, %arg10: memref<58x128xbf16, #tpu.memory_space<vmem>>) attributes {dimension_semantics = [#tpu.dimension_semantics<parallel>], iteration_bounds = array<i64: 1>, scalar_prefetch = 0 : i64, scratch_operands = 2 : i64, tpu.core_type = #tpu.core_type<tc>, window_params = [{transform_indices = @transform_0, window_bounds = array<i64: 1, 72, 256>}, {pipeline_mode = #tpu.pipeline_mode<synchronous>, transform_indices = @transform_1, window_bounds = array<i64: 1024, 128>}, {pipeline_mode = #tpu.pipeline_mode<synchronous>, transform_indices = @transform_2, window_bounds = array<i64: 1, 128>}, {pipeline_mode = #tpu.pipeline_mode<synchronous>, transform_indices = @transform_3, window_bounds = array<i64: 512, 128>}, {pipeline_mode = #tpu.pipeline_mode<synchronous>, transform_indices = @transform_4, window_bounds = array<i64: 1, 128>}, {pipeline_mode = #tpu.pipeline_mode<synchronous>, transform_indices = @transform_5, window_bounds = array<i64: 1152, 64>}, {pipeline_mode = #tpu.pipeline_mode<synchronous>, transform_indices = @transform_6, window_bounds = array<i64: 1, 64>}, {transform_indices = @transform_7, window_bounds = array<i64: 1, 72, 64>}]} {
    %c0 = arith.constant 0 : index
    %c0_0 = arith.constant 0 : index
    %c0_1 = arith.constant 0 : index
    %0 = vector.load %arg1[%c0, %c0_0, %c0_1] : memref<1x72x256xbf16, #tpu.memory_space<vmem>>, vector<1x65x256xbf16>
    %1 = vector.shape_cast %0 : vector<1x65x256xbf16> to vector<65x256xbf16>
    %c0_2 = arith.constant 0 : index
    %c1 = arith.constant 1 : index
    %c0_3 = arith.constant 0 : index
    %2 = vector.load %arg1[%c0_2, %c1, %c0_3] : memref<1x72x256xbf16, #tpu.memory_space<vmem>>, vector<1x65x256xbf16>
    %3 = vector.shape_cast %2 : vector<1x65x256xbf16> to vector<65x256xbf16>
    %c0_4 = arith.constant 0 : index
    %c6 = arith.constant 6 : index
    %c0_5 = arith.constant 0 : index
    %4 = vector.load %arg1[%c0_4, %c6, %c0_5] : memref<1x72x256xbf16, #tpu.memory_space<vmem>>, vector<1x65x256xbf16>
    %5 = vector.shape_cast %4 : vector<1x65x256xbf16> to vector<65x256xbf16>
    %c0_6 = arith.constant 0 : index
    %c7 = arith.constant 7 : index
    %c0_7 = arith.constant 0 : index
    %6 = vector.load %arg1[%c0_6, %c7, %c0_7] : memref<1x72x256xbf16, #tpu.memory_space<vmem>>, vector<1x65x256xbf16>
    %7 = vector.shape_cast %6 : vector<1x65x256xbf16> to vector<65x256xbf16>
    %8 = tpu.concatenate %1, %3, %5, %7 in 1 : vector<65x256xbf16>, vector<65x256xbf16>, vector<65x256xbf16>, vector<65x256xbf16> -> vector<65x1024xbf16>
    %c0_8 = arith.constant 0 : index
    %c0_9 = arith.constant 0 : index
    %9 = vector.load %arg2[%c0_8, %c0_9] : memref<1024x128xbf16, #tpu.memory_space<vmem>>, vector<1024x128xbf16>
    %cst = arith.constant dense<0.000000e+00> : vector<65x128xf32>
    %10 = tpu.matmul %8, %9, %cst {dimension_numbers = #tpu.dot_dimension_numbers<[1], [0], [0], [1], [0, 0, 1, 1], [], []>} : vector<65x1024xbf16>, vector<1024x128xbf16>, vector<65x128xf32> -> vector<65x128xf32>
    %c0_10 = arith.constant 0 : index
    %c0_11 = arith.constant 0 : index
    %11 = vector.load %arg3[%c0_10, %c0_11] : memref<1x128xf32, #tpu.memory_space<vmem>>, vector<1x128xf32>
    %12 = vector.broadcast %11 : vector<1x128xf32> to vector<65x128xf32>
    %13 = arith.addf %10, %12 : vector<65x128xf32>
    %cst_12 = arith.constant 0.000000e+00 : f32
    %14 = vector.broadcast %cst_12 : f32 to vector<65x128xf32>
    %15 = arith.maximumf %13, %14 : vector<65x128xf32>
    %16 = arith.truncf %15 : vector<65x128xf32> to vector<65x128xbf16>
    %c0_13 = arith.constant 0 : index
    %c0_14 = arith.constant 0 : index
    %17 = vector.load %arg9[%c0_13, %c0_14] : memref<65x128xbf16, #tpu.memory_space<vmem>>, vector<65x128xbf16>
    tpu.vector_store %arg9[%c0_13, %c0_14], %16 {strides = array<i32>} : memref<65x128xbf16, #tpu.memory_space<vmem>>, vector<65x128xbf16>,
    %c0_15 = arith.constant 0 : index
    %c0_16 = arith.constant 0 : index
    %18 = vector.load %arg9[%c0_15, %c0_16] : memref<65x128xbf16, #tpu.memory_space<vmem>>, vector<58x128xbf16>
    %c1_17 = arith.constant 1 : index
    %c0_18 = arith.constant 0 : index
    %19 = vector.load %arg9[%c1_17, %c0_18] : memref<65x128xbf16, #tpu.memory_space<vmem>>, vector<58x128xbf16>
    %c6_19 = arith.constant 6 : index
    %c0_20 = arith.constant 0 : index
    %20 = vector.load %arg9[%c6_19, %c0_20] : memref<65x128xbf16, #tpu.memory_space<vmem>>, vector<58x128xbf16>
    %c7_21 = arith.constant 7 : index
    %c0_22 = arith.constant 0 : index
    %21 = vector.load %arg9[%c7_21, %c0_22] : memref<65x128xbf16, #tpu.memory_space<vmem>>, vector<58x128xbf16>
    %22 = tpu.concatenate %18, %19, %20, %21 in 1 : vector<58x128xbf16>, vector<58x128xbf16>, vector<58x128xbf16>, vector<58x128xbf16> -> vector<58x512xbf16>
    %c0_23 = arith.constant 0 : index
    %c0_24 = arith.constant 0 : index
    %23 = vector.load %arg4[%c0_23, %c0_24] : memref<512x128xbf16, #tpu.memory_space<vmem>>, vector<512x128xbf16>
    %cst_25 = arith.constant dense<0.000000e+00> : vector<58x128xf32>
    %24 = tpu.matmul %22, %23, %cst_25 {dimension_numbers = #tpu.dot_dimension_numbers<[1], [0], [0], [1], [0, 0, 1, 1], [], []>} : vector<58x512xbf16>, vector<512x128xbf16>, vector<58x128xf32> -> vector<58x128xf32>
    %c0_26 = arith.constant 0 : index
    %c0_27 = arith.constant 0 : index
    %25 = vector.load %arg5[%c0_26, %c0_27] : memref<1x128xf32, #tpu.memory_space<vmem>>, vector<1x128xf32>
    %26 = vector.broadcast %25 : vector<1x128xf32> to vector<58x128xf32>
    %27 = arith.addf %24, %26 : vector<58x128xf32>
    %cst_28 = arith.constant 0.000000e+00 : f32
    %28 = vector.broadcast %cst_28 : f32 to vector<58x128xf32>
    %29 = arith.maximumf %27, %28 : vector<58x128xf32>
    %30 = arith.truncf %29 : vector<58x128xf32> to vector<58x128xbf16>
    %c0_29 = arith.constant 0 : index
    %c0_30 = arith.constant 0 : index
    %31 = vector.load %arg10[%c0_29, %c0_30] : memref<58x128xbf16, #tpu.memory_space<vmem>>, vector<58x128xbf16>
    tpu.vector_store %arg10[%c0_29, %c0_30], %30 {strides = array<i32>} : memref<58x128xbf16, #tpu.memory_space<vmem>>, vector<58x128xbf16>,
    %c0_31 = arith.constant 0 : index
    %c0_32 = arith.constant 0 : index
    %32 = vector.load %arg10[%c0_31, %c0_32] : memref<58x128xbf16, #tpu.memory_space<vmem>>, vector<44x128xbf16>
    %c1_33 = arith.constant 1 : index
    %c0_34 = arith.constant 0 : index
    %33 = vector.load %arg10[%c1_33, %c0_34] : memref<58x128xbf16, #tpu.memory_space<vmem>>, vector<44x128xbf16>
    %c2 = arith.constant 2 : index
    %c0_35 = arith.constant 0 : index
    %34 = vector.load %arg10[%c2, %c0_35] : memref<58x128xbf16, #tpu.memory_space<vmem>>, vector<44x128xbf16>
    %c6_36 = arith.constant 6 : index
    %c0_37 = arith.constant 0 : index
    %35 = vector.load %arg10[%c6_36, %c0_37] : memref<58x128xbf16, #tpu.memory_space<vmem>>, vector<44x128xbf16>
    %c7_38 = arith.constant 7 : index
    %c0_39 = arith.constant 0 : index
    %36 = vector.load %arg10[%c7_38, %c0_39] : memref<58x128xbf16, #tpu.memory_space<vmem>>, vector<44x128xbf16>
    %c8 = arith.constant 8 : index
    %c0_40 = arith.constant 0 : index
    %37 = vector.load %arg10[%c8, %c0_40] : memref<58x128xbf16, #tpu.memory_space<vmem>>, vector<44x128xbf16>
    %c12 = arith.constant 12 : index
    %c0_41 = arith.constant 0 : index
    %38 = vector.load %arg10[%c12, %c0_41] : memref<58x128xbf16, #tpu.memory_space<vmem>>, vector<44x128xbf16>
    %c13 = arith.constant 13 : index
    %c0_42 = arith.constant 0 : index
    %39 = vector.load %arg10[%c13, %c0_42] : memref<58x128xbf16, #tpu.memory_space<vmem>>, vector<44x128xbf16>
    %c14 = arith.constant 14 : index
    %c0_43 = arith.constant 0 : index
    %40 = vector.load %arg10[%c14, %c0_43] : memref<58x128xbf16, #tpu.memory_space<vmem>>, vector<44x128xbf16>
    %41 = tpu.concatenate %32, %33, %34, %35, %36, %37, %38, %39, %40 in 1 : vector<44x128xbf16>, vector<44x128xbf16>, vector<44x128xbf16>, vector<44x128xbf16>, vector<44x128xbf16>, vector<44x128xbf16>, vector<44x128xbf16>, vector<44x128xbf16>, vector<44x128xbf16> -> vector<44x1152xbf16>
    %c0_44 = arith.constant 0 : index
    %c0_45 = arith.constant 0 : index
    %42 = vector.load %arg6[%c0_44, %c0_45] : memref<1152x64xbf16, #tpu.memory_space<vmem>>, vector<1152x64xbf16>
    %cst_46 = arith.constant dense<0.000000e+00> : vector<44x64xf32>
    %43 = tpu.matmul %41, %42, %cst_46 {dimension_numbers = #tpu.dot_dimension_numbers<[1], [0], [0], [1], [0, 0, 1, 1], [], []>} : vector<44x1152xbf16>, vector<1152x64xbf16>, vector<44x64xf32> -> vector<44x64xf32>
    %c0_47 = arith.constant 0 : index
    %c0_48 = arith.constant 0 : index
    %44 = vector.load %arg7[%c0_47, %c0_48] : memref<1x64xf32, #tpu.memory_space<vmem>>, vector<1x64xf32>
    %45 = vector.broadcast %44 : vector<1x64xf32> to vector<44x64xf32>
    %46 = arith.addf %43, %45 : vector<44x64xf32>
    %cst_49 = arith.constant 0.000000e+00 : f32
    %47 = vector.broadcast %cst_49 : f32 to vector<44x64xf32>
    %48 = arith.maximumf %46, %47 : vector<44x64xf32>
    %c0_50 = arith.constant 0 : index
    %c0_51 = arith.constant 0 : index
    %c0_52 = arith.constant 0 : index
    %49 = vector.load %arg8[%c0_50, %c0_51, %c0_52] : memref<1x72x64xf32, #tpu.memory_space<vmem>>, vector<1x44x64xf32>
    %50 = vector.shape_cast %49 : vector<1x44x64xf32> to vector<44x64xf32>
    %51 = vector.shape_cast %48 : vector<44x64xf32> to vector<1x44x64xf32>
    tpu.vector_store %arg8[%c0_50, %c0_51, %c0_52], %51 {strides = array<i32>} : memref<1x72x64xf32, #tpu.memory_space<vmem>>, vector<1x44x64xf32>,
    return
  }
  func.func @transform_0(%arg0: i32) -> (i32, i32, i32) {
    %c0_i32 = arith.constant 0 : i32
    %c0_i32_0 = arith.constant 0 : i32
    %c0_i32_1 = arith.constant 0 : i32
    return %arg0, %c0_i32, %c0_i32_0 : i32, i32, i32
  }
  func.func @transform_1(%arg0: i32) -> (i32, i32) {
    %c0_i32 = arith.constant 0 : i32
    %c0_i32_0 = arith.constant 0 : i32
    %c0_i32_1 = arith.constant 0 : i32
    return %c0_i32, %c0_i32_0 : i32, i32
  }
  func.func @transform_2(%arg0: i32) -> (i32, i32) {
    %c0_i32 = arith.constant 0 : i32
    %c0_i32_0 = arith.constant 0 : i32
    %c0_i32_1 = arith.constant 0 : i32
    return %c0_i32, %c0_i32_0 : i32, i32
  }
  func.func @transform_3(%arg0: i32) -> (i32, i32) {
    %c0_i32 = arith.constant 0 : i32
    %c0_i32_0 = arith.constant 0 : i32
    %c0_i32_1 = arith.constant 0 : i32
    return %c0_i32, %c0_i32_0 : i32, i32
  }
  func.func @transform_4(%arg0: i32) -> (i32, i32) {
    %c0_i32 = arith.constant 0 : i32
    %c0_i32_0 = arith.constant 0 : i32
    %c0_i32_1 = arith.constant 0 : i32
    return %c0_i32, %c0_i32_0 : i32, i32
  }
  func.func @transform_5(%arg0: i32) -> (i32, i32) {
    %c0_i32 = arith.constant 0 : i32
    %c0_i32_0 = arith.constant 0 : i32
    %c0_i32_1 = arith.constant 0 : i32
    return %c0_i32, %c0_i32_0 : i32, i32
  }
  func.func @transform_6(%arg0: i32) -> (i32, i32) {
    %c0_i32 = arith.constant 0 : i32
    %c0_i32_0 = arith.constant 0 : i32
    %c0_i32_1 = arith.constant 0 : i32
    return %c0_i32, %c0_i32_0 : i32, i32
  }
  func.func @transform_7(%arg0: i32) -> (i32, i32, i32) {
    %c0_i32 = arith.constant 0 : i32
    %c0_i32_0 = arith.constant 0 : i32
    %c0_i32_1 = arith.constant 0 : i32
    return %arg0, %c0_i32, %c0_i32_0 : i32, i32, i32
  }
}

</mosaic_0001>

<bundles_post_ra>
// kernel: tile.8
= control target key start
LH: loop header
LB: loop body
LE: loop exit
PB: predicated region body
PF: predicated region fallthrough
CT: control target
= control target key end

     0   :  { %s22_s0 = inlined_call_operand.vmem [shape: f32[32], index: 0, kind: input, shape index: {}]   ;;  %s23_s1 = inlined_call_operand.vmem [shape: f32[4,32], index: 1, kind: output, shape index: {}]  }
   0x1   :  { %v4_v0 = vld [vmem:[%s22_s0] ss:$0 sm:$0xff] }
   0x2   :  { %5 = vst [vmem:[%s23_s1] sm:$0xf] %v4_v0 }

// kernel: tile.9
= control target key start
LH: loop header
LB: loop body
LE: loop exit
PB: predicated region body
PF: predicated region fallthrough
CT: control target
= control target key end

     0   :  { %vm8_vm0 = vcmask 261120   ;;  %s40_s8 = smov 32   ;;  %s41_s9 = smov 64   ;;  %vm14_vm1 = vcmask 1048320   ;;  %vm20_vm2 = vcmask 785920   ;;  %vm26_vm3 = vcmask 523520   ;;  %s58_s0 = inlined_call_operand.vmem [shape: f32[4,32], index: 0, kind: input, shape index: {}]   ;;  %s59_s1 = inlined_call_operand.vmem [shape: f32[1,128], index: 1, kind: output, shape index: {}]  }
   0x1   :  { %v5_v0 = vld [vmem:[%s58_s0] sm:$0xf]  ;;  %s39_s0 = smov 96  }
   0x2   :  { %6 = vst [vmem:[#allocation1] sm:$0xf] %v5_v0 }
   0x9   :  { %v11_v1 = vld [vmem:[#allocation1 + $0x3] sm:$0x1]   ;;  %v23_v2 = vld [vmem:[#allocation1 + $0x1] sm:$0x1]   ;;  %v7_v3 = vld [vmem:[#allocation1] sm:$0x1]  }
   0xa   :  { %12 = vrot.lane.b32.xlu0 %v11_v1, %s39_s0  ;;  %24 = vrot.lane.b32.xlu1 %v23_v2, %s40_s8  ;;  %v17_v4 = vld [vmem:[#allocation1 + $0x2] sm:$0x1]   ;;  %9 = vst.msk [vmem:[#allocation0] sm:$0x1] %vm8_vm0, %v7_v3  }
   0xe   :  { %18 = vrot.lane.b32.xlu0 %v17_v4, %s41_s9 }
  0x7c   :  { %v13_v5 = vpop.permute.xlu0 %12   ;;  %v25_v6 = vpop.permute.xlu1 %24  }
  0x7d   :  { %15 = vst.msk [vmem:[#allocation0] sm:$0x1] %vm14_vm1, %v13_v5  }
  0x80   :  { %v19_v7 = vpop.permute.xlu0 %18  }
  0x81   :  { %21 = vst.msk [vmem:[#allocation0] sm:$0x1] %vm20_vm2, %v19_v7  }
  0x82   :  { %27 = vst.msk [vmem:[#allocation0] sm:$0x1] %vm26_vm3, %v25_v6  }
  0x89   :  { %v32_v8 = vld [vmem:[#allocation0] sm:$0x1] }
  0x8a   :  { %35 = vst [vmem:[%s59_s1] sm:$0x1] %v32_v8 }

// kernel: base_network_forward.1
= control target key start
LH: loop header
LB: loop body
LE: loop exit
PB: predicated region body
PF: predicated region fallthrough
CT: control target
= control target key end

     0   :  { %vm85_vm0 = vsmask.f32 7424  ;;  %vm182_vm1 = vcmask 1044480   ;;  %vm211_vm2 = vsmask.f32 4352  ;;  %vm1141_vm3 = vcmask 1040384   ;;  %s4700_s1 = inlined_call_operand.vmem [shape: bf16[1024,128], index: 1, kind: input, shape index: {}]   ;;  %s4701_s0 = inlined_call_operand.vmem [shape: bf16[1,72,256], index: 0, kind: input, shape index: {}]   ;;  %s4702_s3 = inlined_call_operand.vmem [shape: bf16[512,128], index: 3, kind: input, shape index: {}]   ;;  %s4703_s2 = inlined_call_operand.vmem [shape: f32[1,128], index: 2, kind: input, shape index: {}]   ;;  %s4704_s5 = inlined_call_operand.vmem [shape: bf16[1152,64], index: 5, kind: input, shape index: {}]   ;;  %s4705_s4 = inlined_call_operand.vmem [shape: f32[1,128], index: 4, kind: input, shape index: {}]   ;;  %s4706_s6 = inlined_call_operand.vmem [shape: f32[1,64], index: 6, kind: input, shape index: {}]   ;;  %s4707_s7 = inlined_call_operand.vmem [shape: f32[1,72,64], index: 7, kind: output, shape index: {}]  }
   0x1   :  { %v3544_v0 = vld [vmem:[%s4700_s1 + $0x78] sm:$0xff]   ;;  %v3548_v4 = vld [vmem:[%s4700_s1 + $0x70] sm:$0xff]   ;;  %v3552_v8 = vld [vmem:[%s4700_s1 + $0x68] sm:$0xff]   ;;  %vm1142_vm4 = vsmask.f32 256  ;;  %vm1782_vm6 = vcmask 1046528  }
   0x2   :  { %v3545_v1 = vld [vmem:[%s4700_s1 + $0xf8] sm:$0xff]   ;;  %3087 = vmatprep.subr.bf16.mxu0 %v3544_v0  ;;  %v3549_v5 = vld [vmem:[%s4700_s1 + $0xf0] sm:$0xff]   ;;  %v3553_v9 = vld [vmem:[%s4700_s1 + $0xe8] sm:$0xff]   ;;  %vm1870_vm7 = vsmask.f32 5376  ;;  %vm1858_vm8 = vcmask 1045504  }
   0x3   :  { %v3546_v2 = vld [vmem:[%s4700_s1 + $0x38] sm:$0xff]   ;;  %3133 = vmatprep.subr.bf16.mxu1 %v3545_v1  ;;  %v3550_v6 = vld [vmem:[%s4700_s1 + $0x30] sm:$0xff]   ;;  %v3554_v10 = vld [vmem:[%s4700_s1 + $0x28] sm:$0xff]   ;;  %vm3754_vm9 = vmmov 0   ;;  %vm2792_vm10 = vcmask 523264   ;;  %vm2798_vm11 = vcmask 519168  }
   0x4   :  { %v3547_v3 = vld [vmem:[%s4700_s1 + $0xb8] sm:$0xff]   ;;  %3088 = vmatpush3.bf16.msra.mxu0 %v3546_v2  ;;  %v3551_v7 = vld [vmem:[%s4700_s1 + $0xb0] sm:$0xff]   ;;  %v3555_v11 = vld [vmem:[%s4700_s1 + $0xa8] sm:$0xff]  }
   0x5   :  { %3134 = vmatpush3.bf16.msra.mxu1 %v3547_v3  ;;  %3089 = vmatprep.subr.bf16.mxu0 %v3548_v4  ;;  %v3556_v12 = vld [vmem:[%s4700_s1 + $0x60] sm:$0xff]   ;;  %v3560_v16 = vld [vmem:[%s4700_s1 + $0x58] sm:$0xff]   ;;  %v3564_v20 = vld [vmem:[%s4700_s1 + $0x50] sm:$0xff]  }
   0x6   :  { %3135 = vmatprep.subr.bf16.mxu1 %v3549_v5  ;;  %v3557_v13 = vld [vmem:[%s4700_s1 + $0xe0] sm:$0xff]   ;;  %v3561_v17 = vld [vmem:[%s4700_s1 + $0xd8] sm:$0xff]   ;;  %v3565_v21 = vld [vmem:[%s4700_s1 + $0xd0] sm:$0xff]  }
   0x7   :  { %v3558_v14 = vld [vmem:[%s4700_s1 + $0x20] sm:$0xff]   ;;  %v3562_v18 = vld [vmem:[%s4700_s1 + $0x18] sm:$0xff]   ;;  %v3566_v22 = vld [vmem:[%s4700_s1 + $0x10] sm:$0xff]  }
   0x8   :  { %3090 = vmatpush3.bf16.msra.mxu0 %v3550_v6  ;;  %v3559_v15 = vld [vmem:[%s4700_s1 + $0xa0] sm:$0xff]   ;;  %v3563_v19 = vld [vmem:[%s4700_s1 + $0x98] sm:$0xff]   ;;  %v3567_v23 = vld [vmem:[%s4700_s1 + $0x90] sm:$0xff]  }
   0x9   :  { %3136 = vmatpush3.bf16.msra.mxu1 %v3551_v7  ;;  %3091 = vmatprep.subr.bf16.mxu0 %v3552_v8  ;;  %v3568_v24 = vld [vmem:[%s4700_s1 + $0x48] sm:$0xff]   ;;  %v3572_v28 = vld [vmem:[%s4700_s1 + $0x40] sm:$0xff]   ;;  %v3903_v35 = vld [vmem:[%s4701_s0 + $0x14] ss:$8 sps:$4 sm:$0xff]  }
   0xa   :  { %3137 = vmatprep.subr.bf16.mxu1 %v3553_v9  ;;  %v3569_v25 = vld [vmem:[%s4700_s1 + $0xc8] sm:$0xff]   ;;  %v3573_v29 = vld [vmem:[%s4700_s1 + $0xc0] sm:$0xff]   ;;  %v3909_v37 = vld [vmem:[%s4701_s0 + $0x10] ss:$8 sps:$4 sm:$0xff]   ;;  %v106_v41 = vshll.u32 %v3903_v35, 16  ;;  %v118_v55 = vshrl.u32 %v3903_v35, 16 }
   0xb   :  { %v3570_v26 = vld [vmem:[%s4700_s1 + $0x8] sm:$0xff]   ;;  %v3574_v30 = vld [vmem:[%s4700_s1] sm:$0xff]   ;;  %v3581_v38 = vld [vmem:[%s4700_s1 + $0x178] sm:$0xff]   ;;  %v94_v44 = vshll.u32 %v3909_v37, 16  ;;  %v110_v59 = vshrl.u32 %v3909_v37, 16 }
   0xc   :  { %3092 = vmatpush3.bf16.msra.mxu0 %v3554_v10  ;;  %v3571_v27 = vld [vmem:[%s4700_s1 + $0x88] sm:$0xff]   ;;  %v3575_v31 = vld [vmem:[%s4700_s1 + $0x80] sm:$0xff]   ;;  %v3582_v45 = vld [vmem:[%s4700_s1 + $0x138] sm:$0xff]   ;;  %v108_v48 = vrot.slane %v106_v41, 1 }
   0xd   :  { %3138 = vmatpush3.bf16.msra.mxu1 %v3555_v11  ;;  %3093 = vmatprep.subr.bf16.mxu0 %v3556_v12  ;;  %v27_v32 = vld [vmem:[%s4701_s0] sm:$0xff]  ;;  %v3897_v33 = vld [vmem:[%s4701_s0 + $0x8] sm:$0xff]  ;;  %v3583_v46 = vld [vmem:[%s4700_s1 + $0x1f8] sm:$0xff]   ;;  %v96_v50 = vrot.slane %v94_v44, 1 }
   0xe   :  { %3139 = vmatprep.subr.bf16.mxu1 %v3557_v13  ;;  %v2805_v34 = vcombine.high %v27_v32, %v3897_v33  ;;  %v2804_v36 = vcombine.low %v27_v32, %v3897_v33  ;;  %v3584_v51 = vld [vmem:[%s4700_s1 + $0x1b8] sm:$0xff]   ;;  %v3585_v54 = vld [vmem:[%s4700_s1 + $0x170] sm:$0xff]   ;;  %v3943_v60 = vld [vmem:[%s4701_s0 + $0x24] ss:$8 sps:$4 sm:$0xff]   ;;  %v120_v63 = vor.u32 %v118_v55, %v108_v48 }
   0xf   :  { %v3586_v58 = vld [vmem:[%s4700_s1 + $0x130] sm:$0xff]   ;;  %v3951_v62 = vld [vmem:[%s4701_s0 + $0x20] ss:$8 sps:$4 sm:$0xff]   ;;  %v122_v0 = vshll.u32 %v3943_v60, 16  ;;  %v112_v2 = vor.u32 %v110_v59, %v96_v50  ;;  %v134_v11 = vshrl.u32 %v3943_v60, 16  ;;  %vm1143_vm5 = vmand %vm1141_vm3, %vm1142_vm4 }
  0x10   :  { %3094 = vmatpush3.bf16.msra.mxu0 %v3558_v14  ;;  %831 = vmatprep.mubr.bf16.mxu0 %v2805_v34  ;;  %v99_v39 = vshrl.u32 %v2805_v34, 16  ;;  %v101_v40 = vshll.u32 %v2805_v34, 16  ;;  %v89_v42 = vshll.u32 %v2804_v36, 16  ;;  %v87_v43 = vshrl.u32 %v2804_v36, 16  ;;  %v3589_v61 = vld [vmem:[%s4700_s1 + $0x1f0] sm:$0xff]   ;;  %v3592_v4 = vld [vmem:[%s4700_s1 + $0x168] sm:$0xff]  }
  0x11   :  { %3140 = vmatpush3.bf16.msra.mxu1 %v3559_v15  ;;  %3095 = vmatprep.subr.bf16.mxu0 %v3560_v16  ;;  %v3591_v1 = vld [vmem:[%s4700_s1 + $0x1b0] sm:$0xff]   ;;  %v114_v3 = vshll.u32 %v3951_v62, 16  ;;  %v124_v5 = vrot.slane %v122_v0, 1  ;;  %v3593_v6 = vld [vmem:[%s4700_s1 + $0x128] sm:$0xff]   ;;  %v126_v12 = vshrl.u32 %v3951_v62, 16  ;;  %v3598_v15 = vld [vmem:[%s4700_s1 + $0x160] sm:$0xff]  }
  0x12   :  { %3141 = vmatprep.subr.bf16.mxu1 %v3561_v17  ;;  %v103_v47 = vrot.slane %v101_v40, 1  ;;  %v91_v49 = vrot.slane %v89_v42, 1  ;;  %v3594_v8 = vld [vmem:[%s4700_s1 + $0x1e8] sm:$0xff]   ;;  %v3987_v14 = vld [vmem:[%s4701_s0 + $0x34] ss:$8 sps:$4 sm:$0xff]  }
  0x13   :  { %v116_v7 = vrot.slane %v114_v3, 1  ;;  %v125_v9 = vsel %vm85_vm0, %v120_v63, %v124_v5  ;;  %v3595_v10 = vld [vmem:[%s4700_s1 + $0x1a8] sm:$0xff]   ;;  %v3995_v16 = vld [vmem:[%s4701_s0 + $0x30] ss:$8 sps:$4 sm:$0xff]   ;;  %v136_v17 = vor.u32 %v134_v11, %v124_v5  ;;  %v35_v34 = vld [vmem:[%s4701_s0 + $0x40] sm:$0x11] }
  0x14   :  { %3096 = vmatpush3.bf16.msra.mxu0 %v3562_v18  ;;  %v104_v52 = vor.u32 %v103_v47, %v99_v39  ;;  %v92_v53 = vor.u32 %v91_v49, %v87_v43  ;;  %v138_v18 = vshll.u32 %v3987_v14, 16  ;;  %v142_v32 = vshrl.u32 %v3995_v16, 16  ;;  %v3609_v40 = vld [vmem:[%s4700_s1 + $0x150] sm:$0xff]   ;;  %v3617_v63 = vld [vmem:[%s4700_s1 + $0x140] sm:$0xff]  }
  0x15   :  { %3142 = vmatpush3.bf16.msra.mxu1 %v3563_v19  ;;  %3097 = vmatprep.subr.bf16.mxu0 %v3564_v20  ;;  %v117_v13 = vsel %vm85_vm0, %v112_v2, %v116_v7  ;;  %v3600_v19 = vld [vmem:[%s4700_s1 + $0x120] sm:$0xff]   ;;  %v128_v20 = vor.u32 %v126_v12, %v116_v7  ;;  %v4037_v39 = vcombine.low %v35_v34, %v35_v34  ;;  %v3610_v47 = vld [vmem:[%s4700_s1 + $0x110] sm:$0xff]   ;;  %v232_v7 = vrot.slane %v118_v55, 3 }
  0x16   :  { %3143 = vmatprep.subr.bf16.mxu1 %v3565_v21  ;;  %v109_v56 = vsel %vm85_vm0, %v104_v52, %v108_v48  ;;  %v97_v57 = vsel %vm85_vm0, %v92_v53, %v96_v50  ;;  %v130_v21 = vshll.u32 %v3995_v16, 16  ;;  %v3611_v48 = vld [vmem:[%s4700_s1 + $0x1d0] sm:$0xff]   ;;  %v3613_v52 = vld [vmem:[%s4700_s1 + $0x148] sm:$0xff]   ;;  %v3619_v2 = vld [vmem:[%s4700_s1 + $0x1c0] sm:$0xff]   ;;  %v220_v55 = vrot.slane %v110_v59, 3 }
  0x17   :  { %903 = vmatprep.mubr.bf16.mxu1 %v109_v56  ;;  %v3614_v53 = vld [vmem:[%s4700_s1 + $0x108] sm:$0xff]   ;;  %v3620_v5 = vld [vmem:[%s4700_s1 + $0x180] sm:$0xff]  }
  0x18   :  { %3098 = vmatpush3.bf16.msra.mxu0 %v3566_v22  ;;  %v3601_v22 = vld [vmem:[%s4700_s1 + $0x1e0] sm:$0xff]  }
  0x19   :  { %3144 = vmatpush3.bf16.msra.mxu1 %v3567_v23  ;;  %3099 = vmatprep.subr.bf16.mxu0 %v3568_v24  ;;  %v140_v23 = vrot.slane %v138_v18, 1  ;;  %v3602_v24 = vld [vmem:[%s4700_s1 + $0x1a0] sm:$0xff]  }
  0x1a   :  { %3145 = vmatprep.subr.bf16.mxu1 %v3569_v25  ;;  %v132_v25 = vrot.slane %v130_v21, 1 }
  0x1c   :  { %3100 = vmatpush3.bf16.msra.mxu0 %v3570_v26  ;;  %v3603_v26 = vld [vmem:[%s4700_s1 + $0x158] sm:$0xff]  }
  0x1d   :  { %3146 = vmatpush3.bf16.msra.mxu1 %v3571_v27  ;;  %3101 = vmatprep.subr.bf16.mxu0 %v3572_v28  ;;  %v141_v27 = vsel %vm85_vm0, %v136_v17, %v140_v23  ;;  %v3604_v28 = vld [vmem:[%s4700_s1 + $0x118] sm:$0xff]   ;;  %v184_v17 = vrot.slane %v3909_v37, 3 }
  0x1e   :  { %3147 = vmatprep.subr.bf16.mxu1 %v3573_v29  ;;  %v150_v29 = vshrl.u32 %v3987_v14, 16 }
  0x20   :  { %3102 = vmatpush3.bf16.msra.mxu0 %v3574_v30  ;;  %v133_v30 = vsel %vm85_vm0, %v128_v20, %v132_v25  ;;  %v152_v42 = vor.u32 %v150_v29, %v140_v23 }
  0x21   :  { %3148 = vmatpush3.bf16.msra.mxu1 %v3575_v31  ;;  %3179 = vmatprep.subr.bf16.mxu0 %v3581_v38  ;;  %v3605_v31 = vld [vmem:[%s4700_s1 + $0x1d8] sm:$0xff]  }
  0x22   :  { %3225 = vmatprep.subr.bf16.mxu1 %v3583_v46  ;;  %v3607_v38 = vld [vmem:[%s4700_s1 + $0x198] sm:$0xff]   ;;  %v146_v46 = vshll.u32 %v4037_v39, 16 }
  0x23   :  { %832 = vmatmul.mubr.bf16.vlgmr.msra.gmra.mxu0 %v2804_v36  ;;  %v2813_v36 = vcombine.high %v35_v34, %v35_v34 }
  0x24   :  { %839 = vmatprep.mubr.bf16.mxu0 %v3903_v35  ;;  %3180 = vmatpush3.bf16.msra.mxu0 %v3582_v45  ;;  %v144_v45 = vor.u32 %v142_v32, %v132_v25  ;;  %v148_v50 = vrot.slane %v146_v46, 1 }
  0x25   :  { %3181 = vmatprep.subr.bf16.mxu0 %v3585_v54  ;;  %904 = vmatmul.mubr.bf16.vlgmr.msra.gmra.mxu1 %v97_v57  ;;  %v154_v43 = vshll.u32 %v2813_v36, 16  ;;  %v160_v57 = vshrl.u32 %v2813_v36, 16 }
  0x26   :  { %3226 = vmatpush3.bf16.msra.mxu1 %v3584_v51  ;;  %911 = vmatprep.mubr.bf16.mxu1 %v125_v9  ;;  %v3612_v51 = vld [vmem:[%s4700_s1 + $0x190] sm:$0xff]   ;;  %v149_v56 = vsel %vm85_vm0, %v144_v45, %v148_v50  ;;  %v191_v9 = vrot.slane %v3943_v60, 3  ;;  %v237_v45 = vrot.slane %v114_v3, 4 }
  0x27   :  { %3227 = vmatprep.subr.bf16.mxu1 %v3589_v61  ;;  %v156_v49 = vrot.slane %v154_v43, 1  ;;  %v3616_v61 = vld [vmem:[%s4700_s1 + $0x188] sm:$0xff]   ;;  %v236_v43 = vrot.slane %v126_v12, 3 }
  0x28   :  { %3182 = vmatpush3.bf16.msra.mxu0 %v3586_v58  ;;  %v3615_v58 = vld [vmem:[%s4700_s1 + $0x1c8] sm:$0xff]  }
  0x29   :  { %3183 = vmatprep.subr.bf16.mxu0 %v3592_v4  ;;  %v157_v54 = vsel %vm85_vm0, %v152_v42, %v156_v49  ;;  %v187_v4 = vrot.slane %v3903_v35, 3  ;;  %v240_v35 = vrot.slane %v134_v11, 3 }
  0x2a   :  { %3228 = vmatpush3.bf16.msra.mxu1 %v3591_v1  ;;  %v3618_v1 = vld [vmem:[%s4700_s1 + $0x100] sm:$0xff]  }
  0x2b   :  { %840 = vmatmul.mubr.bf16.gmra.mxu0 %v3909_v37  ;;  %3229 = vmatprep.subr.bf16.mxu1 %v3594_v8  ;;  %v233_v8 = vrot.slane %v106_v41, 4  ;;  %v241_v41 = vrot.slane %v122_v0, 4 }
  0x2c   :  { %847 = vmatprep.mubr.bf16.mxu0 %v3943_v60  ;;  %3184 = vmatpush3.bf16.msra.mxu0 %v3593_v6  ;;  %v36_v6 = vld [vmem:[%s4701_s0] sm:$0x88] }
  0x2d   :  { %912 = vmatmul.mubr.bf16.gmra.mxu1 %v117_v13  ;;  %3185 = vmatprep.subr.bf16.mxu0 %v3598_v15  ;;  %v2814_v13 = vcombine.low %v36_v6, %v3897_v33  ;;  %v2815_v15 = vcombine.high %v36_v6, %v3897_v33  ;;  %v234_v33 = vor.u32 %v233_v8, %v232_v7 }
  0x2e   :  { %3230 = vmatpush3.bf16.msra.mxu1 %v3595_v10  ;;  %919 = vmatprep.mubr.bf16.mxu1 %v141_v27  ;;  %v158_v10 = vshrl.u32 %v4037_v39, 16  ;;  %v192_v27 = vsel %vm182_vm1, %v187_v4, %v191_v9 }
  0x2f   :  { %3231 = vmatprep.subr.bf16.mxu1 %v3601_v22  ;;  %v186_v20 = vrot.slane %v2815_v15, 3  ;;  %v225_v22 = vshrl.u32 %v2815_v15, 16  ;;  %v228_v23 = vshll.u32 %v2815_v15, 16  ;;  %v213_v25 = vshrl.u32 %v2814_v13, 16  ;;  %v3625_v15 = vld [vmem:[%s4702_s3 + $0x78] sm:$0xff]  }
  0x30   :  { %3186 = vmatpush3.bf16.msra.mxu0 %v3600_v19  ;;  %v221_v19 = vrot.slane %v94_v44, 4 }
  0x31   :  { %3187 = vmatprep.subr.bf16.mxu0 %v3603_v26  ;;  %v216_v26 = vshll.u32 %v2814_v13, 16  ;;  %v188_v37 = vsel %vm182_vm1, %v186_v20, %v187_v4  ;;  %v227_v44 = vrot.slane %v225_v22, 3  ;;  %v230_v59 = vrot.slane %v228_v23, 4  ;;  %v3631_v20 = vld [vmem:[%s4702_s3 + $0xf0] sm:$0xff]   ;;  %v3633_v23 = vld [vmem:[%s4702_s3 + $0x68] sm:$0xff]  }
  0x32   :  { %3232 = vmatpush3.bf16.msra.mxu1 %v3602_v24  ;;  %v183_v24 = vrot.slane %v2814_v13, 3  ;;  %v215_v60 = vrot.slane %v213_v25, 3  ;;  %v222_v11 = vor.u32 %v221_v19, %v220_v55  ;;  %v3627_v19 = vld [vmem:[%s4702_s3 + $0xf8] sm:$0xff]   ;;  %v3632_v22 = vld [vmem:[%s4702_s3 + $0xb0] sm:$0xff]   ;;  %v3636_v25 = vld [vmem:[%s4702_s3 + $0xa8] sm:$0xff]  }
  0x33   :  { %848 = vmatmul.mubr.bf16.gmra.mxu0 %v3951_v62  ;;  %3233 = vmatprep.subr.bf16.mxu1 %v3605_v31  ;;  %v218_v0 = vrot.slane %v216_v26, 4  ;;  %v242_v31 = vor.u32 %v241_v41, %v240_v35  ;;  %v3628_v55 = vld [vmem:[%s4702_s3 + $0xb8] sm:$0xff]   ;;  %v3629_v35 = vld [vmem:[%s4702_s3 + $0x70] sm:$0xff]   ;;  %v3637_v26 = vld [vmem:[%s4702_s3 + $0x60] sm:$0xff]  }
  0x34   :  { %855 = vmatprep.mubr.bf16.mxu0 %v3987_v14  ;;  %3188 = vmatpush3.bf16.msra.mxu0 %v3604_v28  ;;  %v185_v28 = vsel %vm182_vm1, %v183_v24, %v184_v17  ;;  %v3630_v41 = vld [vmem:[%s4702_s3 + $0x30] sm:$0xff]   ;;  %v3634_v24 = vld [vmem:[%s4702_s3 + $0x28] sm:$0xff]  }
  0x35   :  { %920 = vmatmul.mubr.bf16.gmra.mxu1 %v133_v30  ;;  %3189 = vmatprep.subr.bf16.mxu0 %v3609_v40  ;;  %v231_v30 = vor.u32 %v230_v59, %v227_v44  ;;  %v219_v34 = vor.u32 %v218_v0, %v215_v60  ;;  %v195_v40 = vrot.slane %v3987_v14, 3  ;;  %v243_v46 = vsel %vm211_vm2, %v234_v33, %v242_v31  ;;  %v3640_v44 = vld [vmem:[%s4702_s3 + $0xa0] sm:$0xff]   ;;  %v3641_v59 = vld [vmem:[%s4702_s3 + $0x58] sm:$0xff]  }
  0x36   :  { %3234 = vmatpush3.bf16.msra.mxu1 %v3607_v38  ;;  %927 = vmatprep.mubr.bf16.mxu1 %v157_v54  ;;  %v37_v38 = vld [vmem:[%s4701_s0 + $0x40] sm:$0xff]  ;;  %v244_v14 = vrot.slane %v142_v32, 3  ;;  %v3643_v60 = vld [vmem:[%s4702_s3 + $0xd8] sm:$0xff]  }
  0x37   :  { %3235 = vmatprep.subr.bf16.mxu1 %v3611_v48  ;;  %v223_v42 = vsel %vm211_vm2, %v219_v34, %v222_v11  ;;  %v249_v48 = vrot.slane %v138_v18, 4  ;;  %v2817_v49 = vcombine.high %v37_v38, %v37_v38  ;;  %v245_v18 = vrot.slane %v130_v21, 4  ;;  %v3644_v0 = vld [vmem:[%s4702_s3 + $0x98] sm:$0xff]   ;;  %v3648_v34 = vld [vmem:[%s4702_s3 + $0x90] sm:$0xff]  }
  0x38   :  { %3190 = vmatpush3.bf16.msra.mxu0 %v3610_v47  ;;  %v248_v47 = vrot.slane %v150_v29, 3 }
  0x39   :  { %3191 = vmatprep.subr.bf16.mxu0 %v3613_v52  ;;  %v238_v52 = vor.u32 %v237_v45, %v236_v43  ;;  %v265_v3 = vshll.u32 %v2817_v49, 16  ;;  %v199_v54 = vrot.slane %v2817_v49, 3  ;;  %v3654_v43 = vld [vmem:[%s4702_s3] sm:$0xff]  }
  0x3a   :  { %3236 = vmatpush3.bf16.msra.mxu1 %v3612_v51  ;;  %v196_v51 = vsel %vm182_vm1, %v191_v9, %v195_v40  ;;  %v250_v12 = vor.u32 %v249_v48, %v248_v47  ;;  %v3655_v45 = vld [vmem:[%s4702_s3 + $0xc0] sm:$0xff]  }
  0x3b   :  { %856 = vmatmul.mubr.bf16.gmra.mxu0 %v3995_v16  ;;  %3237 = vmatprep.subr.bf16.mxu1 %v3615_v58  ;;  %v239_v29 = vsel %vm211_vm2, %v222_v11, %v238_v52  ;;  %v3645_v11 = vld [vmem:[%s4702_s3 + $0x50] sm:$0xff]  }
  0x3c   :  { %863 = vmatprep.mubr.bf16.mxu0 %v2813_v36  ;;  %3192 = vmatpush3.bf16.msra.mxu0 %v3614_v53  ;;  %v189_v36 = vrot.slane %v3951_v62, 3  ;;  %v262_v62 = vshrl.u32 %v2817_v49, 16  ;;  %v193_v53 = vrot.slane %v3995_v16, 3 }
  0x3d   :  { %928 = vmatmul.mubr.bf16.gmra.mxu1 %v149_v56  ;;  %3193 = vmatprep.subr.bf16.mxu0 %v3617_v63  ;;  %v2816_v56 = vcombine.low %v37_v38, %v37_v38  ;;  %v3650_v38 = vld [vmem:[%s4702_s3 + $0x8] sm:$0xff]  }
  0x3e   :  { %935 = vmatprep.mubr.bf16.mxu1 %v160_v57  ;;  %3238 = vmatpush3.bf16.msra.mxu1 %v3616_v61  ;;  %v190_v50 = vsel %vm182_vm1, %v184_v17, %v189_v36  ;;  %v251_v57 = vsel %vm211_vm2, %v242_v31, %v250_v12  ;;  %v264_v58 = vrot.slane %v262_v62, 3  ;;  %v267_v61 = vrot.slane %v265_v3, 4  ;;  %v3626_v17 = vld [vmem:[%s4702_s3 + $0x38] sm:$0xff]   ;;  %v3647_v31 = vld [vmem:[%s4702_s3 + $0xd0] sm:$0xff]  }
  0x3f   :  { %3239 = vmatprep.subr.bf16.mxu1 %v3619_v2  ;;  %v194_v63 = vsel %vm182_vm1, %v189_v36, %v193_v53  ;;  %v246_v2 = vor.u32 %v245_v18, %v244_v14  ;;  %v253_v4 = vshrl.u32 %v2816_v56, 16  ;;  %v197_v32 = vrot.slane %v2816_v56, 3  ;;  %v3649_v36 = vld [vmem:[%s4702_s3 + $0x48] sm:$0xff]  }
  0x40   :  { %3194 = vmatpush3.bf16.msra.mxu0 %v3618_v1  ;;  %v200_v1 = vsel %vm182_vm1, %v195_v40, %v199_v54  ;;  %v268_v6 = vor.u32 %v267_v61, %v264_v58  ;;  %v3652_v40 = vld [vmem:[%s4702_s3 + $0x88] sm:$0xff]  }
  0x41   :  { %v247_v16 = vsel %vm211_vm2, %v238_v52, %v246_v2  ;;  %v255_v21 = vrot.slane %v253_v4, 3  ;;  %v198_v9 = vsel %vm182_vm1, %v193_v53, %v197_v32  ;;  %3271 = vmatprep.subr.bf16.mxu0 %v3625_v15 }
  0x42   :  { %3240 = vmatpush3.bf16.msra.mxu1 %v3620_v5  ;;  %v256_v5 = vshll.u32 %v2816_v56, 16  ;;  %v269_v8 = vsel %vm211_vm2, %v250_v12, %v268_v6 }
  0x43   :  { %864 = vmatmul.mubr.bf16.gmra.mxu0 %v4037_v39  ;;  %v235_v39 = vsel %vm211_vm2, %v231_v30, %v234_v33  ;;  %3311 = vmatprep.subr.bf16.mxu1 %v3627_v19  ;;  %v3635_v33 = vld [vmem:[%s4702_s3 + $0xe8] sm:$0xff]   ;;  %v3646_v30 = vld [vmem:[%s4702_s3 + $0x10] sm:$0xff]  }
  0x44   :  { %975 = vmatprep.mubr.bf16.mxu0 %v188_v37  ;;  %v258_v7 = vrot.slane %v256_v5, 4  ;;  %v3639_v37 = vld [vmem:[%s4702_s3 + $0xe0] sm:$0xff]  }
  0x45   :  { %936 = vmatmul.mubr.bf16.gmra.mxu1 %v158_v10 }
  0x46   :  { %1047 = vmatprep.mubr.bf16.mxu1 %v235_v39  ;;  %v259_v10 = vor.u32 %v258_v7, %v255_v21  ;;  %v3651_v39 = vld [vmem:[%s4702_s3 + $0xc8] sm:$0xff]  }
  0x48   :  { %v260_v13 = vsel %vm211_vm2, %v246_v2, %v259_v10 }
  0x4b   :  { %976 = vmatmul.mubr.bf16.vlgmr.msra.gmra.mxu0 %v185_v28  ;;  %v3642_v28 = vld [vmem:[%s4702_s3 + $0x18] sm:$0xff]  }
  0x4c   :  { %983 = vmatprep.mubr.bf16.mxu0 %v192_v27  ;;  %3272 = vmatpush3.bf16.msra.mxu0 %v3626_v17  ;;  %v3638_v27 = vld [vmem:[%s4702_s3 + $0x20] sm:$0xff]  }
  0x4d   :  { %1048 = vmatmul.mubr.bf16.vlgmr.msra.gmra.mxu1 %v223_v42  ;;  %3273 = vmatprep.subr.bf16.mxu0 %v3629_v35  ;;  %v3653_v42 = vld [vmem:[%s4702_s3 + $0x40] sm:$0xff]  }
  0x4e   :  { %1055 = vmatprep.mubr.bf16.mxu1 %v243_v46  ;;  %3312 = vmatpush3.bf16.msra.mxu1 %v3628_v55  ;;  %v3656_v46 = vld [vmem:[%s4702_s3 + $0x80] sm:$0xff]  }
  0x4f   :  { %3313 = vmatprep.subr.bf16.mxu1 %v3631_v20  ;;  %v4272_v20 = vld [vmem:[%s4703_s2] ss:$0 sm:$0xff] }
  0x50   :  { %3274 = vmatpush3.bf16.msra.mxu0 %v3630_v41 }
  0x51   :  { %3275 = vmatprep.subr.bf16.mxu0 %v3633_v23 }
  0x52   :  { %3314 = vmatpush3.bf16.msra.mxu1 %v3632_v22 }
  0x53   :  { %984 = vmatmul.mubr.bf16.gmra.mxu0 %v190_v50  ;;  %3315 = vmatprep.subr.bf16.mxu1 %v3635_v33 }
  0x54   :  { %991 = vmatprep.mubr.bf16.mxu0 %v196_v51  ;;  %3276 = vmatpush3.bf16.msra.mxu0 %v3634_v24 }
  0x55   :  { %1056 = vmatmul.mubr.bf16.gmra.mxu1 %v239_v29  ;;  %3277 = vmatprep.subr.bf16.mxu0 %v3637_v26 }
  0x56   :  { %1063 = vmatprep.mubr.bf16.mxu1 %v251_v57  ;;  %3316 = vmatpush3.bf16.msra.mxu1 %v3636_v25 }
  0x57   :  { %3317 = vmatprep.subr.bf16.mxu1 %v3639_v37 }
  0x58   :  { %3278 = vmatpush3.bf16.msra.mxu0 %v3638_v27 }
  0x59   :  { %3279 = vmatprep.subr.bf16.mxu0 %v3641_v59 }
  0x5a   :  { %3318 = vmatpush3.bf16.msra.mxu1 %v3640_v44 }
  0x5b   :  { %992 = vmatmul.mubr.bf16.gmra.mxu0 %v194_v63  ;;  %3319 = vmatprep.subr.bf16.mxu1 %v3643_v60 }
  0x5c   :  { %999 = vmatprep.mubr.bf16.mxu0 %v200_v1  ;;  %3280 = vmatpush3.bf16.msra.mxu0 %v3642_v28 }
  0x5d   :  { %1064 = vmatmul.mubr.bf16.gmra.mxu1 %v247_v16  ;;  %3281 = vmatprep.subr.bf16.mxu0 %v3645_v11 }
  0x5e   :  { %1071 = vmatprep.mubr.bf16.mxu1 %v269_v8  ;;  %3320 = vmatpush3.bf16.msra.mxu1 %v3644_v0 }
  0x5f   :  { %3321 = vmatprep.subr.bf16.mxu1 %v3647_v31 }
  0x60   :  { %3282 = vmatpush3.bf16.msra.mxu0 %v3646_v30 }
  0x61   :  { %3283 = vmatprep.subr.bf16.mxu0 %v3649_v36 }
  0x62   :  { %3322 = vmatpush3.bf16.msra.mxu1 %v3648_v34 }
  0x63   :  { %1000 = vmatmul.mubr.bf16.gmra.mxu0 %v198_v9  ;;  %3323 = vmatprep.subr.bf16.mxu1 %v3651_v39 }
  0x64   :  { %1007 = vmatprep.mubr.bf16.mxu0 %v199_v54  ;;  %3284 = vmatpush3.bf16.msra.mxu0 %v3650_v38 }
  0x65   :  { %1072 = vmatmul.mubr.bf16.gmra.mxu1 %v260_v13  ;;  %3285 = vmatprep.subr.bf16.mxu0 %v3653_v42 }
  0x66   :  { %1079 = vmatprep.mubr.bf16.mxu1 %v264_v58  ;;  %3324 = vmatpush3.bf16.msra.mxu1 %v3652_v40 }
  0x67   :  { %3325 = vmatprep.subr.bf16.mxu1 %v3655_v45 }
  0x68   :  { %3286 = vmatpush3.bf16.msra.mxu0 %v3654_v43 }
  0x6a   :  { %3326 = vmatpush3.bf16.msra.mxu1 %v3656_v46 }
  0x6b   :  { %1008 = vmatmul.mubr.bf16.gmra.mxu0 %v197_v32 }
  0x6d   :  { %1080 = vmatmul.mubr.bf16.gmra.mxu1 %v255_v21 }
  0xe3   :  { %v3103_v47 = vpop.f32.mrf.mxu0 }
  0xe5   :  { %v3104_v48 = vpop.f32.mrf.mxu0  ;;  %v3149_v51 = vpop.f32.mrf.mxu1 }
  0xe6   :  { %v3105_v41 = vadd.f32 %v3104_v48, %v3103_v47 }
  0xe7   :  { %v3106_v49 = vpop.f32.mrf.mxu0  ;;  %v3150_v12 = vpop.f32.mrf.mxu1 }
  0xe8   :  { %v834_v26 = vadd.f32 %v3105_v41, %v4272_v20  ;;  %v3151_v44 = vadd.f32 %v3150_v12, %v3149_v51 }
  0xe9   :  { %v3107_v50 = vpop.f32.mrf.mxu0  ;;  %v3152_v3 = vpop.f32.mrf.mxu1 }
  0xea   :  { %v3108_v24 = vadd.f32 %v3107_v50, %v3106_v49  ;;  %v906_v11 = vadd.f32 %v3151_v44, %v834_v26 }
  0xeb   :  { %v3109_v52 = vpop.f32.mrf.mxu0  ;;  %v3153_v54 = vpop.f32.mrf.mxu1 }
  0xec   :  { %v837_v59 = vadd.f32 %v3108_v24, %v4272_v20  ;;  %v3154_v30 = vadd.f32 %v3153_v54, %v3152_v3 }
  0xed   :  { %v3110_v62 = vpop.f32.mrf.mxu0  ;;  %v3155_v14 = vpop.f32.mrf.mxu1 }
  0xee   :  { %v3111_v31 = vadd.f32 %v3110_v62, %v3109_v52  ;;  %v909_v40 = vadd.f32 %v3154_v30, %v837_v59 }
  0xef   :  { %v3112_v53 = vpop.f32.mrf.mxu0  ;;  %v3156_v18 = vpop.f32.mrf.mxu1 }
  0xf0   :  { %v842_v46 = vadd.f32 %v3111_v31, %v4272_v20  ;;  %v3157_v12 = vadd.f32 %v3156_v18, %v3155_v14 }
  0xf1   :  { %v3113_v29 = vpop.f32.mrf.mxu0  ;;  %v3158_v57 = vpop.f32.mrf.mxu1 }
  0xf2   :  { %v3114_v36 = vadd.f32 %v3113_v29, %v3112_v53 }
  0xf3   :  { %v3115_v56 = vpop.f32.mrf.mxu0  ;;  %v3159_v61 = vpop.f32.mrf.mxu1 }
  0xf4   :  { %v845_v49 = vadd.f32 %v3114_v36, %v4272_v20  ;;  %v3160_v62 = vadd.f32 %v3159_v61, %v3158_v57 }
  0xf5   :  { %v3116_v58 = vpop.f32.mrf.mxu0  ;;  %v4237_v1 = vpop.f32.mrf.mxu1 }
  0xf6   :  { %v3117_v53 = vadd.f32 %v3116_v58, %v3115_v56  ;;  %v917_v24 = vadd.f32 %v3160_v62, %v845_v49 }
  0xf7   :  { %v4235_v63 = vpop.f32.mrf.mxu0  ;;  %v4241_v4 = vpop.f32.mrf.mxu1 }
  0xf8   :  { %v850_v14 = vadd.f32 %v3117_v53, %v4272_v20  ;;  %v3163_v61 = vadd.f32 %v4241_v4, %v4237_v1 }
  0xf9   :  { %v4239_v2 = vpop.f32.mrf.mxu0  ;;  %v4245_v6 = vpop.f32.mrf.mxu1 }
  0xfa   :  { %v3120_v26 = vadd.f32 %v4239_v2, %v4235_v63  ;;  %v922_v30 = vadd.f32 %v3163_v61, %v850_v14 }
  0xfb   :  { %v4243_v5 = vpop.f32.mrf.mxu0  ;;  %v4249_v16 = vpop.f32.mrf.mxu1 }
  0xfc   :  { %v3166_v36 = vadd.f32 %v4249_v16, %v4245_v6 }
  0xfd   :  { %v4247_v32 = vpop.f32.mrf.mxu0  ;;  %v4253_v7 = vpop.f32.mrf.mxu1 }
  0xff   :  { %v4251_v21 = vpop.f32.mrf.mxu0  ;;  %v4257_v9 = vpop.f32.mrf.mxu1 }
 0x101   :  { %v4255_v8 = vpop.f32.mrf.mxu0  ;;  %v4261_v13 = vpop.f32.mrf.mxu1 }
 0x102   :  { %v3126_v1 = vadd.f32 %v4255_v8, %v4251_v21 }
 0x103   :  { %v4259_v10 = vpop.f32.mrf.mxu0  ;;  %v4265_v17 = vpop.f32.mrf.mxu1 }
 0x105   :  { %v4263_v15 = vpop.f32.mrf.mxu0  ;;  %v4267_v55 = vpop.f32.mrf.mxu1 }
 0x106   :  { %v3129_v21 = vadd.f32 %v4263_v15, %v4259_v10 }
 0x107   :  { %v3130_v19 = vpop.f32.mrf.mxu0  ;;  %v4274_v22 = vpop.f32.mrf.mxu1 }
 0x109   :  { %v3131_v35 = vpop.f32.mrf.mxu0  ;;  %v3176_v33 = vpop.f32.mrf.mxu1 }
 0x10a   :  { %v914_v35 = vadd.f32 %v3157_v12, %v842_v46 }
 0x10b   :  { %v3195_v23 = vpop.f32.mrf.mxu0  ;;  %v3177_v27 = vpop.f32.mrf.mxu1 }
 0x10d   :  { %v3196_v25 = vpop.f32.mrf.mxu0  ;;  %v3241_v60 = vpop.f32.mrf.mxu1 }
 0x10e   :  { %v3197_v28 = vadd.f32 %v3196_v25, %v3195_v23 }
 0x10f   :  { %v3198_v37 = vpop.f32.mrf.mxu0  ;;  %v3242_v38 = vpop.f32.mrf.mxu1 }
 0x110   :  { %v978_v42 = vadd.f32 %v3197_v28, %v906_v11  ;;  %v3243_v47 = vadd.f32 %v3242_v38, %v3241_v60  ;;  %v3123_v38 = vadd.f32 %v4247_v32, %v4243_v5  ;;  %v3169_v5 = vadd.f32 %v4257_v9, %v4253_v7 }
 0x111   :  { %v3199_v0 = vpop.f32.mrf.mxu0  ;;  %v3244_v43 = vpop.f32.mrf.mxu1  ;;  %v861_v32 = vadd.f32 %v3126_v1, %v4272_v20 }
 0x112   :  { %v3200_v34 = vadd.f32 %v3199_v0, %v3198_v37  ;;  %v1050_v19 = vadd.f32 %v3243_v47, %v978_v42  ;;  %v853_v0 = vadd.f32 %v3120_v26, %v4272_v20 }
 0x113   :  { %v3201_v39 = vpop.f32.mrf.mxu0  ;;  %v3245_v50 = vpop.f32.mrf.mxu1 }
 0x114   :  { %v981_v48 = vadd.f32 %v3200_v34, %v909_v40  ;;  %v3246_v3 = vadd.f32 %v3245_v50, %v3244_v43  ;;  %v1087_v27 = vmax.f32 %v1050_v19, 0.0  ;;  %v925_v43 = vadd.f32 %v3166_v36, %v853_v0 }
 0x115   :  { %v3202_v45 = vpop.f32.mrf.mxu0  ;;  %v3247_v54 = vpop.f32.mrf.mxu1  ;;  %v858_v50 = vadd.f32 %v3123_v38, %v4272_v20 }
 0x116   :  { %v3203_v52 = vadd.f32 %v3202_v45, %v3201_v39  ;;  %v1053_v41 = vadd.f32 %v3246_v3, %v981_v48 }
 0x117   :  { %v3204_v51 = vpop.f32.mrf.mxu0  ;;  %v3248_v33 = vpop.f32.mrf.mxu1 }
 0x118   :  { %v1088_v37 = vmax.f32 %v1053_v41, 0.0  ;;  %v986_v44 = vadd.f32 %v3203_v52, %v914_v35  ;;  %v3249_v56 = vadd.f32 %v3248_v33, %v3247_v54  ;;  %v3172_v35 = vadd.f32 %v4265_v17, %v4261_v13 }
 0x119   :  { %v3205_v29 = vpop.f32.mrf.mxu0  ;;  %v3250_v18 = vpop.f32.mrf.mxu1  ;;  %v866_v33 = vadd.f32 %v3129_v21, %v4272_v20 }
 0x11a   :  { %v3206_v23 = vadd.f32 %v3205_v29, %v3204_v51  ;;  %v3050_v57 = vpack.c.bf16 %v1088_v37, %v1087_v27  ;;  %v1058_v11 = vadd.f32 %v3249_v56, %v986_v44  ;;  %v933_v15 = vadd.f32 %v3172_v35, %v861_v32 }
 0x11b   :  { %v3207_v25 = vpop.f32.mrf.mxu0  ;;  %v3251_v28 = vpop.f32.mrf.mxu1  ;;  %v3175_v56 = vadd.f32 %v4274_v22, %v4267_v55 }
 0x11c   :  { %v989_v58 = vadd.f32 %v3206_v23, %v917_v24  ;;  %3051 = vst [vmem:[#allocation2] sm:$0xff] %v3050_v57   ;;  %v3252_v63 = vadd.f32 %v3251_v28, %v3250_v18  ;;  %v1089_v45 = vmax.f32 %v1058_v11, 0.0  ;;  %v930_v23 = vadd.f32 %v3169_v5, %v858_v50 }
 0x11d   :  { %v3208_v59 = vpop.f32.mrf.mxu0  ;;  %v3253_v31 = vpop.f32.mrf.mxu1 }
 0x11e   :  { %v3209_v2 = vadd.f32 %v3208_v59, %v3207_v25  ;;  %v1061_v39 = vadd.f32 %v3252_v63, %v989_v58  ;;  %v938_v63 = vadd.f32 %v3175_v56, %v866_v33 }
 0x11f   :  { %v3210_v60 = vpop.f32.mrf.mxu0  ;;  %v3254_v4 = vpop.f32.mrf.mxu1 }
 0x120   :  { %v1090_v46 = vmax.f32 %v1061_v39, 0.0  ;;  %v994_v47 = vadd.f32 %v3209_v2, %v922_v30  ;;  %v3255_v6 = vadd.f32 %v3254_v4, %v3253_v31 }
 0x121   :  { %v3211_v34 = vpop.f32.mrf.mxu0  ;;  %v3256_v48 = vpop.f32.mrf.mxu1 }
 0x122   :  { %v3212_v40 = vadd.f32 %v3211_v34, %v3210_v60  ;;  %v3055_v51 = vpack.c.bf16 %v1090_v46, %v1089_v45  ;;  %v1066_v62 = vadd.f32 %v3255_v6, %v994_v47 }
 0x123   :  { %v3213_v42 = vpop.f32.mrf.mxu0  ;;  %v3257_v8 = vpop.f32.mrf.mxu1  ;;  %v1147_v19 = vld [vmem:[#allocation2] sm:$0xf]  ;;  %v1148_v3 = vld [vmem:[#allocation2 + $0x4] sm:$0xf] }
 0x124   :  { %v997_v16 = vadd.f32 %v3212_v40, %v925_v43  ;;  %v1156_v52 = vld [vmem:[#allocation2] sm:$0x8]  ;;  %3082 = vst [vmem:[#allocation2 + $0x8] sm:$0xff] %v3055_v51   ;;  %v3258_v53 = vadd.f32 %v3257_v8, %v3256_v48  ;;  %v2892_v29 = vcombine.low %v1147_v19, %v1148_v3  ;;  %v1091_v37 = vmax.f32 %v1066_v62, 0.0 }
 0x125   :  { %v3214_v49 = vpop.f32.mrf.mxu0  ;;  %v3259_v41 = vpop.f32.mrf.mxu1  ;;  %v4300_v9 = vcombine.low %v1156_v52, %v1148_v3 }
 0x126   :  { %v3215_v54 = vadd.f32 %v3214_v49, %v3213_v42  ;;  %v1069_v24 = vadd.f32 %v3258_v53, %v997_v16  ;;  %v1189_v27 = vshll.u32 %v2892_v29, 16  ;;  %v1187_v31 = vshrl.u32 %v2892_v29, 16  ;;  %v1144_v53 = vld [vmem:[#allocation2 + $0x20] sm:$0x1] }
 0x127   :  { %v3216_v12 = vpop.f32.mrf.mxu0  ;;  %v3260_v25 = vpop.f32.mrf.mxu1  ;;  %v1242_v13 = vshrl.u32 %v4300_v9, 16  ;;  %v1245_v17 = vshll.u32 %v4300_v9, 16  ;;  %v1227_v8 = vrot.slane %v4300_v9, 3 }
 0x128   :  { %v1092_v44 = vmax.f32 %v1069_v24, 0.0  ;;  %v1002_v14 = vadd.f32 %v3215_v54, %v930_v23  ;;  %v3261_v18 = vadd.f32 %v3260_v25, %v3259_v41  ;;  %v1191_v0 = vrot.slane %v1189_v27, 1 }
 0x129   :  { %v3217_v7 = vpop.f32.mrf.mxu0  ;;  %v3262_v59 = vpop.f32.mrf.mxu1  ;;  %v1244_v39 = vrot.slane %v1242_v13, 3  ;;  %v1247_v55 = vrot.slane %v1245_v17, 4 }
 0x12a   :  { %v3218_v10 = vadd.f32 %v3217_v7, %v3216_v12  ;;  %v3060_v58 = vpack.c.bf16 %v1092_v44, %v1091_v37  ;;  %v1074_v2 = vadd.f32 %v3261_v18, %v1002_v14  ;;  %v1192_v42 = vor.u32 %v1191_v0, %v1187_v31 }
 0x12b   :  { %v3219_v26 = vpop.f32.mrf.mxu0  ;;  %v3263_v20 = vpop.f32.mrf.mxu1  ;;  %v4307_v60 = vld [vmem:[#allocation2 + $0x8] sm:$0xff]   ;;  %v1248_v6 = vor.u32 %v1247_v55, %v1244_v39  ;;  %v3665_v55 = vld [vmem:[%s4704_s5 + $0xf8] sm:$0xff]  }
 0x12c   :  { %v1005_v61 = vadd.f32 %v3218_v10, %v933_v15  ;;  %3083 = vst [vmem:[#allocation2 + $0x10] sm:$0xff] %v3060_v58   ;;  %v3264_v30 = vadd.f32 %v3263_v20, %v3262_v59  ;;  %v1194_v36 = vshll.u32 %v4307_v60, 16  ;;  %v1198_v38 = vshrl.u32 %v4307_v60, 16  ;;  %3385 = vmatprep.subr.bf16.mxu1 %v3665_v55 }
 0x12d   :  { %v3220_v57 = vpop.f32.mrf.mxu0  ;;  %v3265_v34 = vpop.f32.mrf.mxu1  ;;  %v1093_v47 = vmax.f32 %v1074_v2, 0.0  ;;  %v1228_v50 = vrot.slane %v4307_v60, 3 }
 0x12e   :  { %v3221_v28 = vadd.f32 %v3220_v57, %v3219_v26  ;;  %v1077_v40 = vadd.f32 %v3264_v30, %v1005_v61  ;;  %v1196_v43 = vrot.slane %v1194_v36, 1  ;;  %v1249_v45 = vrot.slane %v1198_v38, 3 }
 0x12f   :  { %v3222_v11 = vpop.f32.mrf.mxu0  ;;  %v3266_v4 = vpop.f32.mrf.mxu1  ;;  %v1250_v46 = vrot.slane %v1194_v36, 4  ;;  %v1229_v62 = vsel %vm182_vm1, %v1227_v8, %v1228_v50  ;;  %v3684_v8 = vld [vmem:[%s4704_s5 + $0x18] sm:$0xff]  }
 0x130   :  { %v1010_v1 = vadd.f32 %v3221_v28, %v938_v63  ;;  %v1094_v48 = vmax.f32 %v1077_v40, 0.0  ;;  %v3267_v49 = vadd.f32 %v3266_v4, %v3265_v34  ;;  %v1197_v51 = vsel %vm85_vm0, %v1192_v42, %v1196_v43  ;;  %v3667_v40 = vld [vmem:[%s4704_s5 + $0x78] sm:$0xff]   ;;  %v3669_v4 = vld [vmem:[%s4704_s5 + $0xf0] sm:$0xff]  }
 0x131   :  { %v3223_v22 = vpop.f32.mrf.mxu0  ;;  %v1251_v16 = vor.u32 %v1250_v46, %v1249_v45  ;;  %v3268_v5 = vpop.f32.mrf.mxu1  ;;  %1570 = vmatprep.mubr.bf16.mxu0 %v1197_v51  ;;  %v1200_v7 = vor.u32 %v1198_v38, %v1196_v43  ;;  %3351 = vmatprep.subr.bf16.mxu0 %v3667_v40  ;;  %v3670_v42 = vld [vmem:[%s4704_s5 + $0xb0] sm:$0xff]   ;;  %v3673_v46 = vld [vmem:[%s4704_s5 + $0xe8] sm:$0xff]   ;;  %v3678_v51 = vld [vmem:[%s4704_s5 + $0xa0] sm:$0xff]  }
 0x132   :  { %v3065_v32 = vpack.c.bf16 %v1094_v48, %v1093_v47  ;;  %v1082_v21 = vadd.f32 %v3267_v49, %v1010_v1  ;;  %1571 = vmatmul.mubr.bf16.vlgmr.msra.gmra.mxu0 %v2892_v29  ;;  %v3666_v22 = vld [vmem:[%s4704_s5 + $0xb8] sm:$0xff]   ;;  %v3671_v43 = vld [vmem:[%s4704_s5 + $0x70] sm:$0xff]   ;;  %v3674_v47 = vld [vmem:[%s4704_s5 + $0xa8] sm:$0xff]  }
 0x133   :  { %v1252_v12 = vsel %vm211_vm2, %v1248_v6, %v1251_v16  ;;  %v3660_v19 = vld [vmem:[#allocation2 + $0x10] sm:$0xff]   ;;  %v3269_v3 = vpop.f32.mrf.mxu1  ;;  %v3668_v1 = vld [vmem:[%s4704_s5 + $0x38] sm:$0xff]   ;;  %v3675_v48 = vld [vmem:[%s4704_s5 + $0x68] sm:$0xff]  }
 0x134   :  { %3084 = vst [vmem:[#allocation2 + $0x18] sm:$0xff] %v3065_v32   ;;  %v1095_v52 = vmax.f32 %v1082_v21, 0.0  ;;  %1635 = vmatprep.mubr.bf16.mxu1 %v1252_v12  ;;  %v1202_v54 = vshll.u32 %v3660_v19, 16  ;;  %v1206_v35 = vshrl.u32 %v3660_v19, 16  ;;  %v1230_v10 = vrot.slane %v3660_v19, 3  ;;  %3352 = vmatpush3.bf16.msra.mxu0 %v3668_v1  ;;  %v3672_v45 = vld [vmem:[%s4704_s5 + $0x30] sm:$0xff]  }
 0x135   :  { %1636 = vmatmul.mubr.bf16.vlgmr.msra.gmra.mxu1 %v1229_v62  ;;  %3353 = vmatprep.subr.bf16.mxu0 %v3671_v43  ;;  %v3676_v49 = vld [vmem:[%s4704_s5 + $0x28] sm:$0xff]   ;;  %v3679_v6 = vld [vmem:[%s4704_s5 + $0x60] sm:$0xff]   ;;  %v3681_v5 = vld [vmem:[%s4704_s5 + $0xd8] sm:$0xff]  }
 0x136   :  { %v3038_v41 = vpack.c.bf16 %v1095_v52, %v1095_v52  ;;  %v1204_v23 = vrot.slane %v1202_v54, 1  ;;  %v1253_v9 = vrot.slane %v1206_v35, 3  ;;  %v1254_v29 = vrot.slane %v1202_v54, 4  ;;  %3386 = vmatpush3.bf16.msra.mxu1 %v3666_v22  ;;  %v3682_v32 = vld [vmem:[%s4704_s5 + $0x98] sm:$0xff]   ;;  %v3685_v12 = vld [vmem:[%s4704_s5 + $0xd0] sm:$0xff]   ;;  %v3689_v62 = vld [vmem:[%s4704_s5 + $0xc8] sm:$0xff]  }
 0x137   :  { %v1231_v44 = vsel %vm182_vm1, %v1228_v50, %v1230_v10  ;;  %3387 = vmatprep.subr.bf16.mxu1 %v3669_v4  ;;  %v3677_v50 = vld [vmem:[%s4704_s5 + $0xe0] sm:$0xff]   ;;  %v3683_v21 = vld [vmem:[%s4704_s5 + $0x58] sm:$0xff]   ;;  %v3687_v3 = vld [vmem:[%s4704_s5 + $0x50] sm:$0xff]  }
 0x138   :  { %v1145_v24 = vsel %vm1143_vm5, %v3038_v41, %v1144_v53  ;;  %v1205_v15 = vsel %vm85_vm0, %v1200_v7, %v1204_v23  ;;  %v1255_v33 = vor.u32 %v1254_v29, %v1253_v9  ;;  %v1208_v17 = vor.u32 %v1206_v35, %v1204_v23  ;;  %3354 = vmatpush3.bf16.msra.mxu0 %v3672_v45  ;;  %v3688_v52 = vld [vmem:[%s4704_s5 + $0x10] sm:$0xff]   ;;  %v3690_v53 = vld [vmem:[%s4704_s5 + $0x88] sm:$0xff]   ;;  %v3693_v41 = vld [vmem:[%s4704_s5 + $0xc0] sm:$0xff]  }
 0x139   :  { %1146 = vst [vmem:[#allocation2 + $0x20] sm:$0x1] %v1145_v24  ;;  %1578 = vmatprep.mubr.bf16.mxu0 %v1205_v15  ;;  %3355 = vmatprep.subr.bf16.mxu0 %v3675_v48  ;;  %v3691_v54 = vld [vmem:[%s4704_s5 + $0x48] sm:$0xff]   ;;  %v3694_v7 = vld [vmem:[%s4704_s5 + $0x80] sm:$0xff]   ;;  %v3699_v29 = vld [vmem:[%s4704_s5 + $0x1f8] sm:$0xff]  }
 0x13a   :  { %1579 = vmatmul.mubr.bf16.gmra.mxu0 %v4307_v60  ;;  %v1256_v25 = vsel %vm211_vm2, %v1251_v16, %v1255_v33  ;;  %3388 = vmatpush3.bf16.msra.mxu1 %v3670_v42  ;;  %v3680_v16 = vld [vmem:[%s4704_s5 + $0x20] sm:$0xff]   ;;  %v3692_v35 = vld [vmem:[%s4704_s5 + $0x8] sm:$0xff]   ;;  %v3703_v24 = vld [vmem:[%s4704_s5 + $0x178] sm:$0xff]  }
 0x13b   :  { %v1153_v26 = vld [vmem:[#allocation2 + $0x18] sm:$0xf]  ;;  %v1155_v27 = vld [vmem:[#allocation2 + $0x1c] sm:$0x3]  ;;  %1643 = vmatprep.mubr.bf16.mxu1 %v1256_v25  ;;  %3389 = vmatprep.subr.bf16.mxu1 %v3673_v46  ;;  %v3695_v23 = vld [vmem:[%s4704_s5 + $0x40] sm:$0xff]  }
 0x13c   :  { %v1157_v37 = vld [vmem:[#allocation2 + $0x1c] sm:$0xf]  ;;  %v2896_v14 = vcombine.low %v1153_v26, %v1155_v27  ;;  %3356 = vmatpush3.bf16.msra.mxu0 %v3676_v49  ;;  %v3696_v9 = vld [vmem:[%s4704_s5] sm:$0xff]  }
 0x13d   :  { %v2898_v18 = vcombine.low %v1153_v26, %v1157_v37  ;;  %1644 = vmatmul.mubr.bf16.gmra.mxu1 %v1231_v44  ;;  %v1154_v38 = vld [vmem:[#allocation2 + $0x1c] sm:$0x1]  ;;  %3357 = vmatprep.subr.bf16.mxu0 %v3679_v6  ;;  %v4430_v15 = vld [vmem:[%s4705_s4] ss:$0 sm:$0xff] }
 0x13e   :  { %v1210_v59 = vshll.u32 %v2896_v14, 16  ;;  %v1214_v58 = vshrl.u32 %v2896_v14, 16  ;;  %v2895_v39 = vcombine.low %v1153_v26, %v1154_v38  ;;  %3390 = vmatpush3.bf16.msra.mxu1 %v3674_v47 }
 0x13f   :  { %v1258_v57 = vshrl.u32 %v2898_v18, 16  ;;  %v1261_v13 = vshll.u32 %v2898_v18, 16  ;;  %v1232_v20 = vrot.slane %v2898_v18, 3  ;;  %3391 = vmatprep.subr.bf16.mxu1 %v3677_v50 }
 0x140   :  { %v1212_v56 = vrot.slane %v1210_v59, 1  ;;  %v3663_v60 = vld [vmem:[#allocation2 + $0x20] ss:$0 sps:$4 sm:$0x11]   ;;  %3358 = vmatpush3.bf16.msra.mxu0 %v3680_v16 }
 0x141   :  { %v1260_v61 = vrot.slane %v1258_v57, 3  ;;  %v1263_v28 = vrot.slane %v1261_v13, 4  ;;  %v1267_v2 = vshll.u32 %v3663_v60, 16  ;;  %v1233_v31 = vsel %vm182_vm1, %v1230_v10, %v1232_v20  ;;  %3359 = vmatprep.subr.bf16.mxu0 %v3683_v21 }
 0x142   :  { %v1213_v0 = vsel %vm85_vm0, %v1208_v17, %v1212_v56  ;;  %v1216_v11 = vor.u32 %v1214_v58, %v1212_v56  ;;  %3392 = vmatpush3.bf16.msra.mxu1 %v3678_v51 }
 0x143   :  { %v1264_v63 = vor.u32 %v1263_v28, %v1260_v61  ;;  %1586 = vmatprep.mubr.bf16.mxu0 %v1213_v0  ;;  %v1269_v34 = vrot.slane %v1267_v2, 4  ;;  %3393 = vmatprep.subr.bf16.mxu1 %v3681_v5 }
 0x144   :  { %1587 = vmatmul.mubr.bf16.gmra.mxu0 %v3660_v19  ;;  %v3686_v19 = vld [vmem:[%s4704_s5 + $0x90] sm:$0xff]  }
 0x145   :  { %v1265_v30 = vsel %vm211_vm2, %v1255_v33, %v1264_v63  ;;  %1594 = vmatprep.mubr.bf16.mxu0 %v1216_v11  ;;  %v1270_v36 = vsel %vm211_vm2, %v1264_v63, %v1269_v34  ;;  %3360 = vmatpush3.bf16.msra.mxu0 %v3684_v8 }
 0x146   :  { %1651 = vmatprep.mubr.bf16.mxu1 %v1265_v30  ;;  %3394 = vmatpush3.bf16.msra.mxu1 %v3682_v32 }
 0x147   :  { %1652 = vmatmul.mubr.bf16.gmra.mxu1 %v1233_v31  ;;  %3395 = vmatprep.subr.bf16.mxu1 %v3685_v12 }
 0x148   :  { %1659 = vmatprep.mubr.bf16.mxu1 %v1270_v36  ;;  %3361 = vmatprep.subr.bf16.mxu0 %v3687_v3 }
 0x149   :  { %3362 = vmatpush3.bf16.msra.mxu0 %v3688_v52 }
 0x14a   :  { %3396 = vmatpush3.bf16.msra.mxu1 %v3686_v19  ;;  %3363 = vmatprep.subr.bf16.mxu0 %v3691_v54 }
 0x14b   :  { %3397 = vmatprep.subr.bf16.mxu1 %v3689_v62 }
 0x14c   :  { %1595 = vmatmul.mubr.bf16.gmra.mxu0 %v2895_v39 }
 0x14d   :  { %3364 = vmatpush3.bf16.msra.mxu0 %v3692_v35 }
 0x14e   :  { %3398 = vmatpush3.bf16.msra.mxu1 %v3690_v53  ;;  %3365 = vmatprep.subr.bf16.mxu0 %v3695_v23 }
 0x14f   :  { %1660 = vmatmul.mubr.bf16.gmra.mxu1 %v1232_v20  ;;  %3399 = vmatprep.subr.bf16.mxu1 %v3693_v41 }
 0x151   :  { %3366 = vmatpush3.bf16.msra.mxu0 %v3696_v9 }
 0x152   :  { %3400 = vmatpush3.bf16.msra.mxu1 %v3694_v7  ;;  %3419 = vmatprep.subr.bf16.mxu0 %v3703_v24 }
 0x153   :  { %3453 = vmatprep.subr.bf16.mxu1 %v3699_v29 }
 0x1f2   :  { %v3287_v10 = vpop.f32.mrf.mxu0 }
 0x1f4   :  { %v3288_v33 = vpop.f32.mrf.mxu0 }
 0x1f5   :  { %v3327_v25 = vpop.f32.mrf.mxu1  ;;  %v3289_v26 = vadd.f32 %v3288_v33, %v3287_v10 }
 0x1f6   :  { %v3290_v27 = vpop.f32.mrf.mxu0 }
 0x1f7   :  { %v3328_v37 = vpop.f32.mrf.mxu1  ;;  %v1573_v44 = vadd.f32 %v3289_v26, %v4430_v15 }
 0x1f8   :  { %v3329_v14 = vadd.f32 %v3328_v37, %v3327_v25  ;;  %v3291_v18 = vpop.f32.mrf.mxu0 }
 0x1f9   :  { %v3330_v59 = vpop.f32.mrf.mxu1  ;;  %v3292_v57 = vadd.f32 %v3291_v18, %v3290_v27 }
 0x1fa   :  { %v3293_v13 = vpop.f32.mrf.mxu0  ;;  %v1638_v56 = vadd.f32 %v3329_v14, %v1573_v44 }
 0x1fb   :  { %v3331_v17 = vpop.f32.mrf.mxu1  ;;  %v1576_v58 = vadd.f32 %v3292_v57, %v4430_v15 }
 0x1fc   :  { %v3332_v61 = vadd.f32 %v3331_v17, %v3330_v59  ;;  %v3294_v28 = vpop.f32.mrf.mxu0  ;;  %v1668_v2 = vmax.f32 %v1638_v56, 0.0 }
 0x1fd   :  { %v3333_v20 = vpop.f32.mrf.mxu1  ;;  %v3295_v0 = vadd.f32 %v3294_v28, %v3293_v13 }
 0x1fe   :  { %v1641_v60 = vadd.f32 %v3332_v61, %v1576_v58  ;;  %v3296_v11 = vpop.f32.mrf.mxu0 }
 0x1ff   :  { %v3334_v63 = vpop.f32.mrf.mxu1  ;;  %v1581_v31 = vadd.f32 %v3295_v0, %v4430_v15 }
 0x200   :  { %v1669_v30 = vmax.f32 %v1641_v60, 0.0  ;;  %v3335_v34 = vadd.f32 %v3334_v63, %v3333_v20  ;;  %v3297_v36 = vpop.f32.mrf.mxu0 }
 0x201   :  { %v3336_v38 = vpop.f32.mrf.mxu1  ;;  %v3298_v55 = vadd.f32 %v3297_v36, %v3296_v11 }
 0x202   :  { %v3070_v39 = vpack.c.bf16 %v1669_v30, %v1668_v2  ;;  %v1646_v40 = vadd.f32 %v3335_v34, %v1581_v31 }
 0x203   :  { %v3337_v22 = vpop.f32.mrf.mxu1  ;;  %v1584_v1 = vadd.f32 %v3298_v55, %v4430_v15 }
 0x204   :  { %3071 = vst [vmem:[#allocation3] sm:$0xff] %v3070_v39   ;;  %v3299_v4 = vpop.f32.mrf.mxu0  ;;  %v3338_v42 = vadd.f32 %v3337_v22, %v3336_v38  ;;  %v1670_v48 = vmax.f32 %v1646_v40, 0.0  ;;  %v3701_v22 = vld [vmem:[%s4704_s5 + $0x1b8] sm:$0xff]  }
 0x206   :  { %v1649_v43 = vadd.f32 %v3338_v42, %v1584_v1  ;;  %v3300_v45 = vpop.f32.mrf.mxu0  ;;  %v3705_v42 = vld [vmem:[%s4704_s5 + $0x1f0] sm:$0xff]  }
 0x207   :  { %v3339_v46 = vpop.f32.mrf.mxu1  ;;  %v3301_v47 = vadd.f32 %v3300_v45, %v3299_v4  ;;  %v3704_v45 = vld [vmem:[%s4704_s5 + $0x138] sm:$0xff]  }
 0x208   :  { %v1671_v49 = vmax.f32 %v1649_v43, 0.0  ;;  %v3302_v50 = vpop.f32.mrf.mxu0 }
 0x209   :  { %v3340_v51 = vpop.f32.mrf.mxu1  ;;  %v1589_v6 = vadd.f32 %v3301_v47, %v4430_v15  ;;  %v3707_v47 = vld [vmem:[%s4704_s5 + $0x170] sm:$0xff]  }
 0x20a   :  { %v3341_v16 = vadd.f32 %v3340_v51, %v3339_v46  ;;  %v3075_v5 = vpack.c.bf16 %v1671_v49, %v1670_v48  ;;  %v3303_v32 = vpop.f32.mrf.mxu0  ;;  %v3712_v51 = vld [vmem:[%s4704_s5 + $0x1e8] sm:$0xff]  }
 0x20b   :  { %v3342_v21 = vpop.f32.mrf.mxu1  ;;  %v3304_v8 = vadd.f32 %v3303_v32, %v3302_v50  ;;  %v4437_v12 = vld [vmem:[#allocation3 + $0x4] sm:$0xf]  ;;  %v1716_v52 = vld [vmem:[#allocation3] sm:$0xf]  ;;  %v3706_v50 = vld [vmem:[%s4704_s5 + $0x1b0] sm:$0xff]  }
 0x20c   :  { %3085 = vst [vmem:[#allocation3 + $0x8] sm:$0xff] %v3075_v5   ;;  %v3305_v19 = vpop.f32.mrf.mxu0  ;;  %v1654_v62 = vadd.f32 %v3341_v16, %v1589_v6  ;;  %v1724_v35 = vld [vmem:[#allocation3] sm:$0x8]  ;;  %v2941_v7 = vcombine.low %v1716_v52, %v4437_v12  ;;  %v1728_v48 = vld [vmem:[#allocation3 + $0x4] sm:$0xc] }
 0x20d   :  { %v3343_v3 = vpop.f32.mrf.mxu1  ;;  %v1592_v53 = vadd.f32 %v3304_v8, %v4430_v15  ;;  %v1723_v41 = vld [vmem:[#allocation3] sm:$0xe]  ;;  %v4442_v25 = vcombine.low %v1724_v35, %v4437_v12 }
 0x20e   :  { %v3344_v54 = vadd.f32 %v3343_v3, %v3342_v21  ;;  %v3306_v23 = vpop.f32.mrf.mxu0  ;;  %v2945_v26 = vcombine.low %v1723_v41, %v4437_v12  ;;  %v1756_v27 = vshll.u32 %v2941_v7, 16  ;;  %v1672_v37 = vmax.f32 %v1654_v62, 0.0  ;;  %v3708_v21 = vld [vmem:[%s4704_s5 + $0x130] sm:$0xff]   ;;  %v3715_v62 = vld [vmem:[%s4704_s5 + $0x168] sm:$0xff]  }
 0x20f   :  { %v3345_v9 = vpop.f32.mrf.mxu1  ;;  %v3307_v24 = vadd.f32 %v3306_v23, %v3305_v19  ;;  %v1800_v60 = vrot.slane %v4442_v25, 3  ;;  %v1754_v36 = vshrl.u32 %v2941_v7, 16 }
 0x210   :  { %v1657_v29 = vadd.f32 %v3344_v54, %v1592_v53  ;;  %v3308_v10 = vpop.f32.mrf.mxu0  ;;  %v1758_v0 = vrot.slane %v1756_v27, 1  ;;  %v1783_v30 = vrot.slane %v2945_v26, 1 }
 0x211   :  { %v3346_v33 = vpop.f32.mrf.mxu1  ;;  %v1597_v14 = vadd.f32 %v3307_v24, %v4430_v15 }
 0x212   :  { %v1673_v44 = vmax.f32 %v1657_v29, 0.0  ;;  %v3347_v18 = vadd.f32 %v3346_v33, %v3345_v9  ;;  %v3309_v59 = vpop.f32.mrf.mxu0 }
 0x213   :  { %v3348_v57 = vpop.f32.mrf.mxu1  ;;  %v3310_v56 = vadd.f32 %v3309_v59, %v3308_v10  ;;  %v4446_v58 = vld [vmem:[#allocation3 + $0x8] sm:$0xf]  ;;  %v1719_v61 = vld [vmem:[#allocation3 + $0xc] sm:$0xf] }
 0x214   :  { %v3080_v13 = vpack.c.bf16 %v1673_v44, %v1672_v37  ;;  %v1662_v17 = vadd.f32 %v3347_v18, %v1597_v14  ;;  %v4449_v20 = vcombine.low %v4446_v58, %v1719_v61  ;;  %v4480_v6 = vcombine.low %v1728_v48, %v4446_v58  ;;  %v3718_v44 = vld [vmem:[%s4704_s5 + $0x1e0] sm:$0xff]   ;;  %v3716_v14 = vld [vmem:[%s4704_s5 + $0x128] sm:$0xff]  }
 0x215   :  { %v3349_v28 = vpop.f32.mrf.mxu1  ;;  %v1600_v63 = vadd.f32 %v3310_v56, %v4430_v15  ;;  %v1759_v15 = vor.u32 %v1758_v0, %v1754_v36 }
 0x216   :  { %3086 = vst [vmem:[#allocation3 + $0x10] sm:$0xff] %v3080_v13   ;;  %v1674_v11 = vmax.f32 %v1662_v17, 0.0  ;;  %v3350_v2 = vadd.f32 %v3349_v28, %v3348_v57  ;;  %v1801_v31 = vrot.slane %v4449_v20, 3  ;;  %v1784_v34 = vrot.slane %v4449_v20, 1  ;;  %v3720_v17 = vld [vmem:[%s4704_s5 + $0x160] sm:$0xff]  }
 0x217   :  { %v1761_v38 = vshll.u32 %v4449_v20, 16  ;;  %v1765_v52 = vshrl.u32 %v4449_v20, 16  ;;  %v1872_v41 = vshrl.u32 %v4480_v6, 16  ;;  %v1875_v9 = vshll.u32 %v4480_v6, 16 }
 0x218   :  { %v3045_v39 = vpack.c.bf16 %v1674_v11, %v1674_v11  ;;  %v1665_v55 = vadd.f32 %v3350_v2, %v1600_v63  ;;  %v1802_v40 = vsel %vm182_vm1, %v1800_v60, %v1801_v31  ;;  %v1785_v1 = vsel %vm1782_vm6, %v1783_v30, %v1784_v34  ;;  %v3722_v60 = vld [vmem:[%s4704_s5 + $0x1d8] sm:$0xff]   ;;  %v3721_v63 = vld [vmem:[%s4704_s5 + $0x120] sm:$0xff]  }
 0x219   :  { %v1763_v4 = vrot.slane %v1761_v38, 1  ;;  %2590 = vmatprep.mubr.bf16.mxu1 %v1802_v40  ;;  %v1874_v0 = vrot.slane %v1872_v41, 2  ;;  %v1877_v11 = vrot.slane %v1875_v9, 3  ;;  %v3723_v2 = vld [vmem:[%s4704_s5 + $0x198] sm:$0xff]  }
 0x21a   :  { %1714 = vst [vmem:[#allocation3 + $0x18] sm:$0xf] %v3045_v39  ;;  %v1675_v43 = vmax.f32 %v1665_v55, 0.0  ;;  %2591 = vmatmul.mubr.bf16.vlgmr.msra.gmra.mxu1 %v1785_v1  ;;  %v3724_v30 = vld [vmem:[%s4704_s5 + $0x158] sm:$0xff]   ;;  %v3729_v55 = vld [vmem:[%s4704_s5 + $0x1d0] sm:$0xff]  }
 0x21b   :  { %v1764_v46 = vsel %vm85_vm0, %v1759_v15, %v1763_v4  ;;  %3454 = vmatpush3.bf16.msra.mxu1 %v3701_v22  ;;  %v1767_v23 = vor.u32 %v1765_v52, %v1763_v4  ;;  %v1878_v39 = vor.u32 %v1877_v11, %v1874_v0  ;;  %v3727_v22 = vld [vmem:[%s4704_s5 + $0x118] sm:$0xff]   ;;  %v3731_v4 = vld [vmem:[%s4704_s5 + $0x150] sm:$0xff]  }
 0x21c   :  { %v3046_v49 = vpack.c.bf16 %v1675_v43, %v1675_v43  ;;  %2533 = vmatprep.mubr.bf16.mxu0 %v1764_v46  ;;  %3455 = vmatprep.subr.bf16.mxu1 %v3705_v42  ;;  %v2950_v42 = vcombine.low %v4437_v12, %v4446_v58  ;;  %v3730_v43 = vld [vmem:[%s4704_s5 + $0x190] sm:$0xff]   ;;  %v3735_v12 = vld [vmem:[%s4704_s5 + $0x148] sm:$0xff]   ;;  %v3741_v9 = vld [vmem:[%s4704_s5 + $0x238] sm:$0xff]  }
 0x21d   :  { %2534 = vmatmul.mubr.bf16.vlgmr.msra.gmra.mxu0 %v2941_v7  ;;  %v4482_v16 = vld [vmem:[#allocation3 + $0x10] sm:$0xf]  ;;  %v4484_v5 = vld [vmem:[#allocation3 + $0x14] sm:$0xf]  ;;  %v3714_v7 = vld [vmem:[%s4704_s5 + $0x1a8] sm:$0xff]  }
 0x21e   :  { %v1722_v32 = vld [vmem:[#allocation3 + $0x14] sm:$0x7]  ;;  %1715 = vst [vmem:[#allocation3 + $0x1c] sm:$0x1] %v3046_v49  ;;  %3420 = vmatpush3.bf16.msra.mxu0 %v3704_v45  ;;  %v4491_v8 = vcombine.low %v4482_v16, %v4484_v5  ;;  %v4494_v19 = vcombine.low %v1719_v61, %v4482_v16  ;;  %v3719_v61 = vld [vmem:[%s4704_s5 + $0x1a0] sm:$0xff]   ;;  %v3733_v45 = vld [vmem:[%s4704_s5 + $0x1c8] sm:$0xff]  }
 0x21f   :  { %v2944_v3 = vcombine.low %v4482_v16, %v1722_v32  ;;  %3421 = vmatprep.subr.bf16.mxu0 %v3707_v47  ;;  %3456 = vmatpush3.bf16.msra.mxu1 %v3706_v50  ;;  %v1721_v36 = vld [vmem:[#allocation3 + $0x14] sm:$0x3]  ;;  %v3732_v46 = vld [vmem:[%s4704_s5 + $0x110] sm:$0xff]   ;;  %v3734_v49 = vld [vmem:[%s4704_s5 + $0x188] sm:$0xff]   ;;  %v1817_v32 = vshll.u32 %v4442_v25, 16 }
 0x220   :  { %v1803_v53 = vrot.slane %v4491_v8, 3  ;;  %3457 = vmatprep.subr.bf16.mxu1 %v3712_v51  ;;  %v1880_v29 = vshrl.u32 %v4494_v19, 16  ;;  %v1883_v24 = vshll.u32 %v4494_v19, 16  ;;  %v2943_v15 = vcombine.low %v4482_v16, %v1721_v36  ;;  %v3737_v50 = vld [vmem:[%s4704_s5 + $0x1c0] sm:$0xff]   ;;  %v3736_v51 = vld [vmem:[%s4704_s5 + $0x108] sm:$0xff]   ;;  %v3748_v36 = vld [vmem:[%s4704_s5 + $0x218] sm:$0xff]  }
 0x221   :  { %v1786_v54 = vrot.slane %v2944_v3, 1  ;;  %v1769_v35 = vshll.u32 %v2944_v3, 16  ;;  %v1773_v27 = vshrl.u32 %v2944_v3, 16  ;;  %v3717_v37 = vld [vmem:[#allocation3 + $0x18] ss:$0 sps:$4 sm:$0x11]  }
 0x222   :  { %3422 = vmatpush3.bf16.msra.mxu0 %v3708_v21  ;;  %v1804_v10 = vsel %vm182_vm1, %v1801_v31, %v1803_v53  ;;  %v1882_v18 = vrot.slane %v1880_v29, 2  ;;  %v1805_v13 = vrot.slane %v3717_v37, 3  ;;  %v1885_v56 = vrot.slane %v1883_v24, 3  ;;  %v3739_v21 = vld [vmem:[%s4704_s5 + $0x140] sm:$0xff]  }
 0x223   :  { %v1787_v33 = vsel %vm1782_vm6, %v1784_v34, %v1786_v54  ;;  %v1771_v26 = vrot.slane %v1769_v35, 1  ;;  %2598 = vmatprep.mubr.bf16.mxu1 %v1804_v10  ;;  %3423 = vmatprep.subr.bf16.mxu0 %v3715_v62  ;;  %v1729_v34 = vld [vmem:[#allocation3 + $0x18] sm:$0xf]  ;;  %v1814_v16 = vshrl.u32 %v4442_v25, 16  ;;  %v3738_v35 = vld [vmem:[%s4704_s5 + $0x180] sm:$0xff]   ;;  %v1860_v41 = vrot.slane %v4494_v19, 2 }
 0x224   :  { %2599 = vmatmul.mubr.bf16.gmra.mxu1 %v1787_v33  ;;  %v1806_v28 = vsel %vm182_vm1, %v1803_v53, %v1805_v13  ;;  %v4540_v31 = vor.u32 %v1885_v56, %v1882_v18  ;;  %v4549_v40 = vcombine.low %v4484_v5, %v1729_v34  ;;  %v1822_v53 = vrot.slane %v1761_v38, 4  ;;  %v3740_v25 = vld [vmem:[%s4704_s5 + $0x100] sm:$0xff]   ;;  %v3744_v56 = vld [vmem:[%s4704_s5 + $0x228] sm:$0xff]  }
 0x225   :  { %v1772_v59 = vsel %vm85_vm0, %v1767_v23, %v1771_v26  ;;  %v1775_v57 = vor.u32 %v1773_v27, %v1771_v26  ;;  %3458 = vmatpush3.bf16.msra.mxu1 %v3714_v7  ;;  %2606 = vmatprep.mubr.bf16.mxu1 %v1806_v28  ;;  %v1816_v7 = vrot.slane %v1814_v16, 3  ;;  %v1819_v23 = vrot.slane %v1817_v32, 4  ;;  %v1727_v26 = vld [vmem:[#allocation3 + $0x18] sm:$0x3] }
 0x226   :  { %2541 = vmatprep.mubr.bf16.mxu0 %v1772_v59  ;;  %3459 = vmatprep.subr.bf16.mxu1 %v3718_v44  ;;  %v1887_v1 = vsel %vm1870_vm7, %v1878_v39, %v4540_v31  ;;  %v1889_v47 = vshrl.u32 %v4549_v40, 16  ;;  %v1892_v48 = vshll.u32 %v4549_v40, 16  ;;  %v1826_v24 = vshrl.u32 %v4491_v8, 16 }
 0x227   :  { %2542 = vmatmul.mubr.bf16.gmra.mxu0 %v4449_v20  ;;  %v4598_v20 = vld [vmem:[#allocation3 + $0x1c] ss:$0 sps:$4 sm:$0x11]   ;;  %v1829_v10 = vshll.u32 %v4491_v8, 16  ;;  %v3753_v33 = vmov 0.0   ;;  %v1820_v37 = vor.u32 %v1819_v23, %v1816_v7  ;;  %v1862_v13 = vrot.slane %v4549_v40, 2 }
 0x228   :  { %3424 = vmatpush3.bf16.msra.mxu0 %v3716_v14  ;;  %2549 = vmatprep.mubr.bf16.mxu0 %v1775_v57  ;;  %v1891_v3 = vrot.slane %v1889_v47, 2  ;;  %v1894_v62 = vrot.slane %v1892_v48, 3  ;;  %v1898_v44 = vshll.u32 %v4598_v20, 16  ;;  %v3742_v14 = vld [vmem:[%s4704_s5 + $0x230] sm:$0xff]   ;;  %v1828_v18 = vrot.slane %v1826_v24, 3 }
 0x229   :  { %3425 = vmatprep.subr.bf16.mxu0 %v3720_v17  ;;  %3460 = vmatpush3.bf16.msra.mxu1 %v3719_v61  ;;  %v1831_v59 = vrot.slane %v1829_v10, 4  ;;  %v2949_v57 = vcombine.low %v1727_v26, %v1727_v26  ;;  %v1863_v0 = vsel %vm1858_vm8, %v1860_v41, %v1862_v13 }
 0x22a   :  { %3461 = vmatprep.subr.bf16.mxu1 %v3722_v60  ;;  %v1895_v38 = vor.u32 %v1894_v62, %v1891_v3  ;;  %v1900_v17 = vrot.slane %v1898_v44, 3 }
 0x22b   :  { %v1832_v61 = vor.u32 %v1831_v59, %v1828_v18  ;;  %v1835_v28 = vshrl.u32 %v2949_v57, 16  ;;  %v1838_v60 = vshll.u32 %v2949_v57, 16 }
 0x22c   :  { %3426 = vmatpush3.bf16.msra.mxu0 %v3721_v63  ;;  %2607 = vmatmul.mubr.bf16.gmra.mxu1 %v1786_v54  ;;  %v1821_v54 = vrot.slane %v1765_v52, 3  ;;  %v1859_v52 = vrot.slane %v4480_v6, 2  ;;  %v1896_v6 = vsel %vm1870_vm7, %v4540_v31, %v1895_v38  ;;  %v1901_v11 = vsel %vm1870_vm7, %v1895_v38, %v1900_v17 }
 0x22d   :  { %3427 = vmatprep.subr.bf16.mxu0 %v3724_v30  ;;  %3462 = vmatpush3.bf16.msra.mxu1 %v3723_v2  ;;  %v2952_v2 = vcombine.low %v4484_v5, %v1727_v26  ;;  %v3747_v30 = vld [vmem:[%s4704_s5 + $0x220] sm:$0xff]   ;;  %v1837_v31 = vrot.slane %v1835_v28, 3  ;;  %v1840_v34 = vrot.slane %v1838_v60, 4 }
 0x22e   :  { %2704 = vmatprep.mubr.bf16.mxu1 %v1887_v1  ;;  %3463 = vmatprep.subr.bf16.mxu1 %v3729_v55  ;;  %v1823_v29 = vor.u32 %v1822_v53, %v1821_v54  ;;  %v1861_v27 = vsel %vm1858_vm8, %v1859_v52, %v1860_v41  ;;  %v3749_v55 = vld [vmem:[%s4704_s5 + $0x210] sm:$0xff]   ;;  %v3751_v1 = vld [vmem:[%s4704_s5 + $0x200] sm:$0xff]  }
 0x22f   :  { %2550 = vmatmul.mubr.bf16.gmra.mxu0 %v2943_v15  ;;  %v1841_v39 = vor.u32 %v1840_v34, %v1837_v31  ;;  %v1731_v15 = vld [vmem:[#allocation3 + $0x4] sm:$0x8] }
 0x230   :  { %3428 = vmatpush3.bf16.msra.mxu0 %v3727_v22  ;;  %2647 = vmatprep.mubr.bf16.mxu0 %v2950_v42  ;;  %v1824_v8 = vsel %vm211_vm2, %v1820_v37, %v1823_v29  ;;  %v1833_v63 = vsel %vm211_vm2, %v1823_v29, %v1832_v61  ;;  %v3750_v22 = vld [vmem:[%s4704_s5 + $0x208] sm:$0xff]   ;;  %v2956_v42 = vcombine.low %v1731_v15, %v4446_v58 }
 0x231   :  { %3429 = vmatprep.subr.bf16.mxu0 %v3731_v4  ;;  %3464 = vmatpush3.bf16.msra.mxu1 %v3730_v43  ;;  %v1842_v5 = vsel %vm211_vm2, %v1832_v61, %v1841_v39  ;;  %v1911_v4 = vrot.slane %v4549_v40, 3  ;;  %v1909_v43 = vrot.slane %v4494_v19, 3  ;;  %v1913_v40 = vrot.slane %v4598_v20, 3 }
 0x232   :  { %3465 = vmatprep.subr.bf16.mxu1 %v3733_v45 }
 0x233   :  { %v1912_v45 = vsel %vm182_vm1, %v1909_v43, %v1911_v4  ;;  %v1914_v58 = vsel %vm182_vm1, %v1911_v4, %v1913_v40 }
 0x234   :  { %3430 = vmatpush3.bf16.msra.mxu0 %v3732_v46  ;;  %v1908_v46 = vrot.slane %v2956_v42, 3 }
 0x235   :  { %3431 = vmatprep.subr.bf16.mxu0 %v3735_v12  ;;  %3466 = vmatpush3.bf16.msra.mxu1 %v3734_v49 }
 0x236   :  { %3467 = vmatprep.subr.bf16.mxu1 %v3737_v50  ;;  %v1910_v12 = vsel %vm182_vm1, %v1908_v46, %v1909_v43 }
 0x238   :  { %3432 = vmatpush3.bf16.msra.mxu0 %v3736_v51 }
 0x239   :  { %3433 = vmatprep.subr.bf16.mxu0 %v3739_v21  ;;  %3468 = vmatpush3.bf16.msra.mxu1 %v3738_v35 }
 0x23a   :  { %3526 = vmatprep.subr.bf16.mxu1 %v3753_v33 }
 0x23c   :  { %3434 = vmatpush3.bf16.msra.mxu0 %v3740_v25  ;;  %2705 = vmatmul.mubr.bf16.vlgmr.msra.gmra.mxu1 %v1861_v27 }
 0x23d   :  { %3498 = vmatprep.subr.bf16.mxu0 %v3753_v33  ;;  %2712 = vmatprep.mubr.bf16.mxu1 %v1896_v6 }
 0x23e   :  { %3534 = vmatpush3.bf16.msra.mxu1 %v3741_v9 }
 0x23f   :  { %2648 = vmatmul.mubr.bf16.vlgmr.msra.gmra.mxu0 %v1824_v8  ;;  %3527 = vmatprep.subr.bf16.mxu1 %v3753_v33 }
 0x240   :  { %2655 = vmatprep.mubr.bf16.mxu0 %v4494_v19  ;;  %3499 = vmatpush3.bf16.msra.mxu0 %v3741_v9 }
 0x241   :  { %3500 = vmatprep.subr.bf16.mxu0 %v3753_v33 }
 0x242   :  { %3535 = vmatpush3.bf16.msra.mxu1 %v3742_v14 }
 0x243   :  { %3528 = vmatprep.subr.bf16.mxu1 %v3753_v33 }
 0x244   :  { %3501 = vmatpush3.bf16.msra.mxu0 %v3742_v14  ;;  %2713 = vmatmul.mubr.bf16.gmra.mxu1 %v1863_v0 }
 0x245   :  { %3502 = vmatprep.subr.bf16.mxu0 %v3753_v33  ;;  %2720 = vmatprep.mubr.bf16.mxu1 %v1901_v11  ;;  %v2957_v11 = vld [vmem:[%s4706_s6] ss:$0 sm:$0xff] }
 0x246   :  { %3536 = vmatpush3.bf16.msra.mxu1 %v3744_v56 }
 0x247   :  { %2656 = vmatmul.mubr.bf16.gmra.mxu0 %v1833_v63  ;;  %3529 = vmatprep.subr.bf16.mxu1 %v3753_v33 }
 0x248   :  { %2663 = vmatprep.mubr.bf16.mxu0 %v2952_v2  ;;  %3503 = vmatpush3.bf16.msra.mxu0 %v3744_v56 }
 0x249   :  { %3504 = vmatprep.subr.bf16.mxu0 %v3753_v33 }
 0x24a   :  { %3537 = vmatpush3.bf16.msra.mxu1 %v3747_v30 }
 0x24b   :  { %3530 = vmatprep.subr.bf16.mxu1 %v3753_v33 }
 0x24c   :  { %3505 = vmatpush3.bf16.msra.mxu0 %v3747_v30  ;;  %2721 = vmatmul.mubr.bf16.gmra.mxu1 %v1862_v13 }
 0x24d   :  { %3506 = vmatprep.subr.bf16.mxu0 %v3753_v33  ;;  %3518 = vmatprep.mubr.msk.bf16.mxu1 %vm3754_vm9, %v3753_v33 }
 0x24e   :  { %3538 = vmatpush3.bf16.msra.mxu1 %v3748_v36 }
 0x24f   :  { %2664 = vmatmul.mubr.bf16.gmra.mxu0 %v1842_v5  ;;  %3531 = vmatprep.subr.bf16.mxu1 %v3753_v33 }
 0x250   :  { %3507 = vmatpush3.bf16.msra.mxu0 %v3748_v36  ;;  %3514 = vmatprep.mubr.msk.bf16.mxu0 %vm3754_vm9, %v3753_v33 }
 0x251   :  { %3508 = vmatprep.subr.bf16.mxu0 %v3753_v33 }
 0x252   :  { %3539 = vmatpush3.bf16.msra.mxu1 %v3749_v55 }
 0x253   :  { %3532 = vmatprep.subr.bf16.mxu1 %v3753_v33 }
 0x254   :  { %3509 = vmatpush3.bf16.msra.mxu0 %v3749_v55 }
 0x255   :  { %3510 = vmatprep.subr.bf16.mxu0 %v3753_v33 }
 0x256   :  { %3540 = vmatpush3.bf16.msra.mxu1 %v3750_v22 }
 0x257   :  { %3533 = vmatprep.subr.bf16.mxu1 %v3753_v33 }
 0x258   :  { %3511 = vmatpush3.bf16.msra.mxu0 %v3750_v22 }
 0x259   :  { %3512 = vmatprep.subr.bf16.mxu0 %v3753_v33 }
 0x25a   :  { %3541 = vmatpush3.bf16.msra.mxu1 %v3751_v1 }
 0x25c   :  { %3513 = vmatpush3.bf16.msra.mxu0 %v3751_v1 }
 0x25d   :  { %3519 = vmatmul.mubr.bf16.vlgmr.msra.gmra.mxu1 %v1912_v45 }
 0x25e   :  { %3522 = vmatprep.mubr.msk.bf16.mxu1 %vm3754_vm9, %v3753_v33 }
 0x25f   :  { %3515 = vmatmul.mubr.bf16.vlgmr.msra.gmra.mxu0 %v1910_v12 }
 0x265   :  { %3523 = vmatmul.mubr.bf16.gmra.mxu1 %v1914_v58 }
 0x2da   :  { %v3401_v47 = vpop.f32.mrf.mxu1 }
 0x2dc   :  { %v3402_v49 = vpop.f32.mrf.mxu1 }
 0x2dd   :  { %v3367_v48 = vpop.f32.mrf.mxu0  ;;  %v3403_v1 = vadd.f32 %v3402_v49, %v3401_v47 }
 0x2de   :  { %v3404_v50 = vpop.f32.mrf.mxu1 }
 0x2df   :  { %v3368_v19 = vpop.f32.mrf.mxu0 }
 0x2e0   :  { %v3405_v16 = vpop.f32.mrf.mxu1  ;;  %v3369_v0 = vadd.f32 %v3368_v19, %v3367_v48 }
 0x2e1   :  { %v3370_v51 = vpop.f32.mrf.mxu0  ;;  %v3406_v48 = vadd.f32 %v3405_v16, %v3404_v50 }
 0x2e2   :  { %v2536_v36 = vadd.f32 %v3369_v0, %v2957_v11 }
 0x2e3   :  { %v3371_v32 = vpop.f32.mrf.mxu0 }
 0x2e4   :  { %v3407_v21 = vpop.f32.mrf.mxu1  ;;  %v3372_v31 = vadd.f32 %v3371_v32, %v3370_v51  ;;  %v2593_v40 = vadd.f32 %v3403_v1, %v2536_v36 }
 0x2e6   :  { %v3408_v62 = vpop.f32.mrf.mxu1  ;;  %v2539_v43 = vadd.f32 %v3372_v31, %v2957_v11 }
 0x2e7   :  { %v3373_v3 = vpop.f32.mrf.mxu0  ;;  %v3409_v39 = vadd.f32 %v3408_v62, %v3407_v21 }
 0x2e8   :  { %v3410_v54 = vpop.f32.mrf.mxu1 }
 0x2e9   :  { %v3374_v53 = vpop.f32.mrf.mxu0 }
 0x2ea   :  { %v3411_v25 = vpop.f32.mrf.mxu1  ;;  %v3375_v28 = vadd.f32 %v3374_v53, %v3373_v3 }
 0x2eb   :  { %v3376_v35 = vpop.f32.mrf.mxu0  ;;  %v3412_v45 = vadd.f32 %v3411_v25, %v3410_v54 }
 0x2ec   :  { %v3413_v7 = vpop.f32.mrf.mxu1  ;;  %v2544_v30 = vadd.f32 %v3375_v28, %v2957_v11 }
 0x2ed   :  { %v3377_v41 = vpop.f32.mrf.mxu0 }
 0x2ee   :  { %v3414_v38 = vpop.f32.mrf.mxu1  ;;  %v3378_v63 = vadd.f32 %v3377_v41, %v3376_v35  ;;  %v2601_v42 = vadd.f32 %v3409_v39, %v2544_v30  ;;  %v2596_v35 = vadd.f32 %v3406_v48, %v2539_v43 }
 0x2ef   :  { %v3379_v23 = vpop.f32.mrf.mxu0  ;;  %v3415_v49 = vadd.f32 %v3414_v38, %v3413_v7 }
 0x2f0   :  { %v4668_v52 = vpop.f32.mrf.mxu1  ;;  %v2547_v55 = vadd.f32 %v3378_v63, %v2957_v11 }
 0x2f1   :  { %v3380_v20 = vpop.f32.mrf.mxu0 }
 0x2f2   :  { %v4670_v29 = vpop.f32.mrf.mxu1  ;;  %v3381_v15 = vadd.f32 %v3380_v20, %v3379_v23  ;;  %v2604_v3 = vadd.f32 %v3412_v45, %v2547_v55 }
 0x2f3   :  { %v3382_v9 = vpop.f32.mrf.mxu0 }
 0x2f4   :  { %v2552_v32 = vadd.f32 %v3381_v15, %v2957_v11 }
 0x2f5   :  { %v3383_v24 = vpop.f32.mrf.mxu0 }
 0x2f6   :  { %v3384_v19 = vadd.f32 %v3383_v24, %v3382_v9  ;;  %v2609_v50 = vadd.f32 %v3415_v49, %v2552_v32  ;;  %v3418_v24 = vadd.f32 %v4670_v29, %v4668_v52 }
 0x2f8   :  { %v2555_v54 = vadd.f32 %v3384_v19, %v2957_v11 }
 0x2fc   :  { %v3469_v10 = vpop.f32.mrf.mxu1 }
 0x2fe   :  { %v3470_v26 = vpop.f32.mrf.mxu1 }
 0x2ff   :  { %v3435_v33 = vpop.f32.mrf.mxu0  ;;  %v3471_v23 = vadd.f32 %v3470_v26, %v3469_v10 }
 0x300   :  { %v3472_v37 = vpop.f32.mrf.mxu1 }
 0x301   :  { %v3436_v27 = vpop.f32.mrf.mxu0 }
 0x302   :  { %v3473_v44 = vpop.f32.mrf.mxu1  ;;  %v3437_v4 = vadd.f32 %v3436_v27, %v3435_v33 }
 0x303   :  { %v3438_v6 = vpop.f32.mrf.mxu0 }
 0x304   :  { %v3475_v14 = vpop.f32.mrf.mxu1  ;;  %v2650_v53 = vadd.f32 %v3437_v4, %v2593_v40 }
 0x305   :  { %v3439_v8 = vpop.f32.mrf.mxu0 }
 0x306   :  { %v3476_v59 = vpop.f32.mrf.mxu1  ;;  %v3440_v21 = vadd.f32 %v3439_v8, %v3438_v6  ;;  %v2707_v9 = vadd.f32 %v3471_v23, %v2650_v53  ;;  %v3474_v6 = vadd.f32 %v3473_v44, %v3472_v37 }
 0x307   :  { %v3441_v18 = vpop.f32.mrf.mxu0  ;;  %v3477_v62 = vadd.f32 %v3476_v59, %v3475_v14 }
 0x308   :  { %v3478_v13 = vpop.f32.mrf.mxu1 }
 0x309   :  { %v3442_v57 = vpop.f32.mrf.mxu0 }
 0x30a   :  { %v3479_v56 = vpop.f32.mrf.mxu1  ;;  %v3443_v5 = vadd.f32 %v3442_v57, %v3441_v18  ;;  %v2653_v57 = vadd.f32 %v3440_v21, %v2596_v35 }
 0x30b   :  { %v3444_v17 = vpop.f32.mrf.mxu0  ;;  %v3480_v25 = vadd.f32 %v3479_v56, %v3478_v13 }
 0x30c   :  { %v3481_v60 = vpop.f32.mrf.mxu1  ;;  %v2658_v58 = vadd.f32 %v3443_v5, %v2601_v42  ;;  %v2710_v29 = vadd.f32 %v3474_v6, %v2653_v57 }
 0x30d   :  { %v3445_v61 = vpop.f32.mrf.mxu0 }
 0x30e   :  { %v3482_v34 = vpop.f32.mrf.mxu1  ;;  %v3446_v46 = vadd.f32 %v3445_v61, %v3444_v17  ;;  %v2715_v33 = vadd.f32 %v3477_v62, %v2658_v58  ;;  %v2612_v17 = vadd.f32 %v3418_v24, %v2555_v54 }
 0x30f   :  { %v3447_v2 = vpop.f32.mrf.mxu0  ;;  %v3483_v61 = vadd.f32 %v3482_v34, %v3481_v60 }
 0x310   :  { %v3484_v12 = vpop.f32.mrf.mxu1  ;;  %v2661_v41 = vadd.f32 %v3446_v46, %v2604_v3 }
 0x311   :  { %v3448_v22 = vpop.f32.mrf.mxu0 }
 0x312   :  { %v3485_v47 = vpop.f32.mrf.mxu1  ;;  %v3449_v20 = vadd.f32 %v3448_v22, %v3447_v2  ;;  %v2718_v59 = vadd.f32 %v3480_v25, %v2661_v41 }
 0x313   :  { %v3450_v51 = vpop.f32.mrf.mxu0  ;;  %v3486_v31 = vadd.f32 %v3485_v47, %v3484_v12 }
 0x314   :  { %v2666_v7 = vadd.f32 %v3449_v20, %v2609_v50 }
 0x315   :  { %v3451_v27 = vpop.f32.mrf.mxu0 }
 0x316   :  { %v3452_v38 = vadd.f32 %v3451_v27, %v3450_v51  ;;  %v2723_v2 = vadd.f32 %v3483_v61, %v2666_v7 }
 0x318   :  { %v2669_v0 = vadd.f32 %v3452_v38, %v2612_v17 }
 0x31a   :  { %v2726_v55 = vadd.f32 %v3486_v31, %v2669_v0 }
 0x31d   :  { %v2771_v18 = vpop.f32.mrf.mxu1 }
 0x31e   :  { %v2772_v16 = vadd.f32 %v2771_v18, %v2715_v33 }
 0x31f   :  { %v2763_v8 = vpop.f32.mrf.mxu0  ;;  %v3520_v14 = vpop.f32.mrf.mxu1 }
 0x320   :  { %v2788_v10 = vmax.f32 %v2772_v16, 0.0  ;;  %v2764_v26 = vadd.f32 %v2763_v8, %v2707_v9 }
 0x321   :  { %v3516_v13 = vpop.f32.mrf.mxu0  ;;  %v2774_v56 = vpop.f32.mrf.mxu1 }
 0x322   :  { %2795 = vst.msk [vmem:[%s4707_s7 + $0x10] sm:$0xff] %vm2792_vm10, %v2788_v10  ;;  %v2786_v28 = vmax.f32 %v2764_v26, 0.0  ;;  %v2775_v52 = vadd.f32 %v2774_v56, %v2718_v59 }
 0x323   :  { %v2766_v37 = vpop.f32.mrf.mxu0  ;;  %v3521_v44 = vpop.f32.mrf.mxu1 }
 0x324   :  { %2793 = vst.msk [vmem:[%s4707_s7] sm:$0xff] %vm2792_vm10, %v2786_v28  ;;  %v2789_v11 = vmax.f32 %v2775_v52, 0.0  ;;  %v2767_v63 = vadd.f32 %v2766_v37, %v2710_v29 }
 0x325   :  { %v3517_v60 = vpop.f32.mrf.mxu0  ;;  %v2779_v30 = vpop.f32.mrf.mxu1 }
 0x326   :  { %2796 = vst.msk [vmem:[%s4707_s7 + $0x18] sm:$0xff] %vm2792_vm10, %v2789_v11  ;;  %v2787_v34 = vmax.f32 %v2767_v63, 0.0  ;;  %v2780_v36 = vadd.f32 %v2779_v30, %v2723_v2 }
 0x327   :  { %v3524_v39 = vpop.f32.mrf.mxu1 }
 0x328   :  { %2794 = vst.msk [vmem:[%s4707_s7 + $0x8] sm:$0xff] %vm2792_vm10, %v2787_v34  ;;  %v2790_v5 = vmax.f32 %v2780_v36, 0.0 }
 0x329   :  { %v2782_v22 = vpop.f32.mrf.mxu1 }
 0x32a   :  { %2797 = vst.msk [vmem:[%s4707_s7 + $0x20] sm:$0xff] %vm2792_vm10, %v2790_v5  ;;  %v2783_v1 = vadd.f32 %v2782_v22, %v2726_v55 }
 0x32b   :  { %v3525_v15 = vpop.f32.mrf.mxu1 }
 0x32c   :  { %v2791_v4 = vmax.f32 %v2783_v1, 0.0 }
 0x32e   :  { %2799 = vst.msk [vmem:[%s4707_s7 + $0x28] sm:$0xf] %vm2798_vm11, %v2791_v4 }

</bundles_post_ra>
